<compile_context>
chip_gen: v7x
topology: tpu7x:2x2x1
jax: 0.10.0
libtpu: 0.0.40
codegen_flags: <defaults>
</compile_context>

<pallas_src>
import numpy as np
import jax
import jax.numpy as jnp
from jax.experimental import pallas as pl
from jax.experimental.pallas import tpu as pltpu  # noqa: F401  (kept for TPU-specific tuning)

# Fixed layer spec (channels / spatial sizes implied by ('fc', 256, 10)).
C_IN, C1, C2 = 4, 8, 16
H = W = 16
HP = WP = 10            # padded 8x8 grid after maxpool (zero ring for conv2's 3x3 taps)
PPI = HP * WP           # padded positions per image (100)
N_POOL = 16             # 4x4 avg-pooled positions per image
N_CLS = 10
BN_EPS = 1e-5


# ----------------------------- fused Pallas kernel ---------------------------------

def _make_fused_kernel(n_batch):
    pc = 4 * n_batch * PPI          # conv1 im2col columns (4 pool phases x n x 10 x 10)
    w_cols = n_batch * PPI          # columns after maxpool (padded layout)
    q = w_cols - 22                 # conv2 output columns (lane-shift / row-offset trick)
    n_valid = n_batch * H * W       # positions entering the BN statistics

    def kernel(p1_ref, w1_ref, b1_ref, g1_ref, be1_ref, mask_ref,
               w2_ref, b2_ref, psel_ref, wfc_ref, bfc_ref, out_ref):
        # ---- conv1: weights-as-LHS GEMM -> lane-dense (C1, pc) output, + bias
        a1 = jnp.dot(w1_ref[...], p1_ref[...],
                     preferred_element_type=jnp.float32) + b1_ref[...]
        # ---- BatchNorm2d (training-mode batch stats; padding ring masked out)
        msk = mask_ref[...]                                          # (1, pc) 0/1
        mean = jnp.sum(a1 * msk, axis=1, keepdims=True) * (1.0 / n_valid)
        xm = a1 - mean
        var = jnp.sum(xm * xm * msk, axis=1, keepdims=True) * (1.0 / n_valid)
        a1 = xm * jax.lax.rsqrt(var + BN_EPS) * g1_ref[...] + be1_ref[...]
        # ---- ReLU
        a1 = jnp.maximum(a1, 0.0)
        # ---- 2x2 maxpool == max over the four pool-phase lane slabs; re-zero pad ring
        p1 = jnp.maximum(
            jnp.maximum(a1[:, 0:w_cols], a1[:, w_cols:2 * w_cols]),
            jnp.maximum(a1[:, 2 * w_cols:3 * w_cols], a1[:, 3 * w_cols:4 * w_cols]))
        p1 = p1 * msk[:, 0:w_cols]                                   # (C1, n*100)
        # ---- conv2: 3x3 taps as nine static lane-shifted slices of the padded layout
        acc2 = None
        for dy in range(3):
            for dx in range(3):
                off = 11 + (dy - 1) * WP + (dx - 1)                  # 0 .. 22
                t = jnp.dot(w2_ref[dy * 3 + dx], p1[:, off:off + q],
                            preferred_element_type=jnp.float32)      # (C2, q)
                acc2 = t if acc2 is None else acc2 + t
        r2 = jnp.maximum(acc2 + b2_ref[...], 0.0)                    # bias + ReLU
        # ---- 2x2 avgpool folded into a constant 0.25-selection matmul (lane-dense)
        pooled = jnp.dot(r2, psel_ref[...],
                         preferred_element_type=jnp.float32)         # (C2, 16*n)
        # ---- flatten (NCHW order) + FC; flatten permutation pre-folded into wfc
        acc = None
        for s in range(N_POOL):
            t = jnp.dot(wfc_ref[s], pooled[:, s * n_batch:(s + 1) * n_batch],
                        preferred_element_type=jnp.float32)          # (10, n)
            acc = t if acc is None else acc + t
        out_ref[...] = acc + bfc_ref[...]                            # (10, n)

    return kernel


# ----------------------------- trace-time layout prep --------------------------------

def _conv1_patches_and_mask(x_nchw):
    """im2col for conv1 with columns ordered (pool-phase, n, padded-y, padded-x)."""
    n = x_nchw.shape[0]
    x = jnp.transpose(x_nchw, (0, 2, 3, 1))                          # NHWC
    xp = jnp.pad(x, ((0, 0), (1, 1), (1, 1), (0, 0)))                # (n, 18, 18, C_IN)
    phase_blocks = []
    for py in range(2):
        for px in range(2):
            taps = []
            for dy in range(3):
                for dx in range(3):
                    taps.append(xp[:, py + dy:py + dy + H:2,
                                      px + dx:px + dx + W:2, :])     # (n, 8, 8, C_IN)
            t = jnp.stack(taps, axis=0)                              # (9, n, 8, 8, C_IN)
            t = jnp.transpose(t, (0, 4, 1, 2, 3))                    # (9, C_IN, n, 8, 8)
            t = jnp.pad(t, ((0, 0), (0, 0), (0, 0), (1, 1), (1, 1)))  # zero ring -> 10x10
            phase_blocks.append(t.reshape(9 * C_IN, n * PPI))
    patches = jnp.concatenate(phase_blocks, axis=1)                  # (36, 4*n*100)

    m = np.zeros((HP, WP), np.float32)
    m[1:1 + H // 2, 1:1 + W // 2] = 1.0
    mask = jnp.asarray(np.tile(m.reshape(1, PPI), (1, 4 * n)))       # (1, 4*n*100)
    return patches, mask


def _avgpool_selector(n):
    """(q, 16*n): 0.25 at the four conv2-output columns of each 2x2 avgpool window."""
    q = n * PPI - 22
    sel = np.zeros((q, N_POOL * n), np.float32)
    for b in range(n):
        for yo in range(4):
            for xo in range(4):
                s = yo * 4 + xo
                for py in range(2):
                    for px in range(2):
                        yy = 2 * yo + py + 1
                        xx = 2 * xo + px + 1
                        sel[b * PPI + yy * WP + xx - 11, s * n + b] = 0.25
    return jnp.asarray(sel)


# ----------------------------- forward ------------------------------------------------

@jax.jit
def cnn_forward(params, x_nchw):
    n = x_nchw.shape[0]
    patches, mask = _conv1_patches_and_mask(x_nchw.astype(jnp.float32))

    # conv1 weight as (C1, 9*C_IN); column order (dy, dx, c) matches the patch rows.
    w1 = jnp.transpose(params["conv1_w"], (0, 2, 3, 1)).reshape(C1, 9 * C_IN)
    b1 = params["conv1_b"].reshape(C1, 1)
    g1 = params["bn1_gamma"].reshape(C1, 1)
    be1 = params["bn1_beta"].reshape(C1, 1)
    # conv2 weight as (9, C2, C1): one (C2, C1) matrix per (dy, dx) tap.
    w2 = jnp.transpose(params["conv2_w"], (2, 3, 0, 1)).reshape(9, C2, C1)
    b2 = params["conv2_b"].reshape(C2, 1)
    # FC weight regrouped per pooled spatial position s: wfc[s, o, c] = fc_w[c*16+s, o]
    # (this folds PyTorch's NCHW flatten permutation into the weights).
    wfc = jnp.transpose(params["fc_w"].reshape(C2, N_POOL, N_CLS), (1, 2, 0))
    bfc = params["fc_b"].reshape(N_CLS, 1)

    psel = _avgpool_selector(n)

    out_t = pl.pallas_call(
        _make_fused_kernel(n),
        out_shape=jax.ShapeDtypeStruct((N_CLS, n), jnp.float32),
    )(patches, w1, b1, g1, be1, mask, w2, b2, psel, wfc, bfc)
    return out_t.T                                                   # (n, 10)


# ----------------------------- params & pure-JAX reference ----------------------------

def init_params(key):
    k1, k2, k3 = jax.random.split(key, 3)
    return {
        "conv1_w": (jax.random.normal(k1, (C1, C_IN, 3, 3), jnp.float32) * 0.1),
        "conv1_b": jnp.linspace(-0.1, 0.1, C1).astype(jnp.float32),
        "bn1_gamma": jnp.ones((C1,), jnp.float32),
        "bn1_beta": jnp.zeros((C1,), jnp.float32),
        "conv2_w": (jax.random.normal(k2, (C2, C1, 3, 3), jnp.float32) * 0.1),
        "conv2_b": jnp.linspace(-0.1, 0.1, C2).astype(jnp.float32),
        "fc_w": (jax.random.normal(k3, (C2 * 4 * 4, N_CLS), jnp.float32) * 0.05),
        "fc_b": jnp.linspace(-0.05, 0.05, N_CLS).astype(jnp.float32),
    }


def cnn_reference(params, x_nchw):
    """Pure-JAX reference with PyTorch semantics for verification."""
    def conv(x, w, b):
        y = jax.lax.conv_general_dilated(x, w, (1, 1), ((1, 1), (1, 1)),
                                         dimension_numbers=("NCHW", "OIHW", "NCHW"))
        return y + b[None, :, None, None]

    z = conv(x_nchw, params["conv1_w"], params["conv1_b"])
    mean = jnp.mean(z, axis=(0, 2, 3), keepdims=True)
    var = jnp.mean((z - mean) ** 2, axis=(0, 2, 3), keepdims=True)
    z = (z - mean) / jnp.sqrt(var + 1e-5)
    z = z * params["bn1_gamma"][None, :, None, None] + params["bn1_beta"][None, :, None, None]
    z = jnp.maximum(z, 0.0)
    z = jax.lax.reduce_window(z, -jnp.inf, jax.lax.max, (1, 1, 2, 2), (1, 1, 2, 2), "VALID")
    z = conv(z, params["conv2_w"], params["conv2_b"])
    z = jnp.maximum(z, 0.0)
    z = jax.lax.reduce_window(z, 0.0, jax.lax.add, (1, 1, 2, 2), (1, 1, 2, 2), "VALID") / 4.0
    z = z.reshape(z.shape[0], -1)
    return z @ params["fc_w"] + params["fc_b"][None, :]


if __name__ == "__main__":
    key = jax.random.PRNGKey(0)
    kx, kp = jax.random.split(key)
    x = jax.random.normal(kx, (2, 4, 16, 16), jnp.float32)   # NCHW, as PyTorch
    params = init_params(kp)

    out = cnn_forward(params, x)
    out = jax.block_until_ready(out)
    assert out.shape == (2, 10), out.shape

    ref = cnn_reference(params, x)
    if not jnp.allclose(out, ref, rtol=1e-3, atol=1e-3):
        raise AssertionError(f"mismatch vs reference: max err "
                             f"{float(jnp.max(jnp.abs(out - ref)))}")
    print("KERNEL_OK")
</pallas_src>

<mosaic_0001>
module attributes {stable_mosaic.version = 11 : i64} {
  func.func @kernel(%arg0: memref<36x800xf32, #tpu.memory_space<vmem>>, %arg1: memref<8x36xf32, #tpu.memory_space<vmem>>, %arg2: memref<8x1xf32, #tpu.memory_space<vmem>>, %arg3: memref<8x1xf32, #tpu.memory_space<vmem>>, %arg4: memref<8x1xf32, #tpu.memory_space<vmem>>, %arg5: memref<1x800xf32, #tpu.memory_space<vmem>>, %arg6: memref<9x16x8xf32, #tpu.memory_space<vmem>>, %arg7: memref<16x1xf32, #tpu.memory_space<vmem>>, %arg8: memref<178x32xf32, #tpu.memory_space<vmem>>, %arg9: memref<16x10x16xf32, #tpu.memory_space<vmem>>, %arg10: memref<10x1xf32, #tpu.memory_space<vmem>>, %arg11: memref<10x2xf32, #tpu.memory_space<vmem>>) attributes {dimension_semantics = [], scalar_prefetch = 0 : i64, scratch_operands = 0 : i64, tpu.core_type = #tpu.core_type<tc>} {
    %c0 = arith.constant 0 : index
    %c0_0 = arith.constant 0 : index
    %0 = vector.load %arg1[%c0, %c0_0] : memref<8x36xf32, #tpu.memory_space<vmem>>, vector<8x36xf32>
    %c0_1 = arith.constant 0 : index
    %c0_2 = arith.constant 0 : index
    %1 = vector.load %arg0[%c0_1, %c0_2] : memref<36x800xf32, #tpu.memory_space<vmem>>, vector<36x800xf32>
    %cst = arith.constant dense<0.000000e+00> : vector<8x800xf32>
    %2 = tpu.matmul %0, %1, %cst {dimension_numbers = #tpu.dot_dimension_numbers<[1], [0], [0], [1], [0, 0, 1, 1], [], []>} : vector<8x36xf32>, vector<36x800xf32>, vector<8x800xf32> -> vector<8x800xf32>
    %c0_3 = arith.constant 0 : index
    %c0_4 = arith.constant 0 : index
    %3 = vector.load %arg2[%c0_3, %c0_4] : memref<8x1xf32, #tpu.memory_space<vmem>>, vector<8x1xf32>
    %4 = vector.broadcast %3 : vector<8x1xf32> to vector<8x800xf32>
    %5 = arith.addf %2, %4 : vector<8x800xf32>
    %c0_5 = arith.constant 0 : index
    %c0_6 = arith.constant 0 : index
    %6 = vector.load %arg5[%c0_5, %c0_6] : memref<1x800xf32, #tpu.memory_space<vmem>>, vector<1x800xf32>
    %7 = vector.broadcast %6 : vector<1x800xf32> to vector<8x800xf32>
    %8 = arith.mulf %5, %7 : vector<8x800xf32>
    %cst_7 = arith.constant dense<0.000000e+00> : vector<8xf32>
    %9 = vector.multi_reduction <add>, %8, %cst_7 [1] : vector<8x800xf32> to vector<8xf32>
    %10 = vector.shape_cast %9 : vector<8xf32> to vector<8x1xf32>
    %cst_8 = arith.constant 0.001953125 : f32
    %11 = vector.broadcast %cst_8 : f32 to vector<8x1xf32>
    %12 = arith.mulf %10, %11 : vector<8x1xf32>
    %13 = vector.broadcast %12 : vector<8x1xf32> to vector<8x800xf32>
    %14 = arith.subf %5, %13 : vector<8x800xf32>
    %15 = arith.mulf %14, %14 : vector<8x800xf32>
    %16 = vector.broadcast %6 : vector<1x800xf32> to vector<8x800xf32>
    %17 = arith.mulf %15, %16 : vector<8x800xf32>
    %cst_9 = arith.constant dense<0.000000e+00> : vector<8xf32>
    %18 = vector.multi_reduction <add>, %17, %cst_9 [1] : vector<8x800xf32> to vector<8xf32>
    %19 = vector.shape_cast %18 : vector<8xf32> to vector<8x1xf32>
    %cst_10 = arith.constant 0.001953125 : f32
    %20 = vector.broadcast %cst_10 : f32 to vector<8x1xf32>
    %21 = arith.mulf %19, %20 : vector<8x1xf32>
    %cst_11 = arith.constant 9.99999974E-6 : f32
    %22 = vector.broadcast %cst_11 : f32 to vector<8x1xf32>
    %23 = arith.addf %21, %22 : vector<8x1xf32>
    %24 = math.rsqrt %23 : vector<8x1xf32>
    %25 = vector.broadcast %24 : vector<8x1xf32> to vector<8x800xf32>
    %26 = arith.mulf %14, %25 : vector<8x800xf32>
    %c0_12 = arith.constant 0 : index
    %c0_13 = arith.constant 0 : index
    %27 = vector.load %arg3[%c0_12, %c0_13] : memref<8x1xf32, #tpu.memory_space<vmem>>, vector<8x1xf32>
    %28 = vector.broadcast %27 : vector<8x1xf32> to vector<8x800xf32>
    %29 = arith.mulf %26, %28 : vector<8x800xf32>
    %c0_14 = arith.constant 0 : index
    %c0_15 = arith.constant 0 : index
    %30 = vector.load %arg4[%c0_14, %c0_15] : memref<8x1xf32, #tpu.memory_space<vmem>>, vector<8x1xf32>
    %31 = vector.broadcast %30 : vector<8x1xf32> to vector<8x800xf32>
    %32 = arith.addf %29, %31 : vector<8x800xf32>
    %cst_16 = arith.constant 0.000000e+00 : f32
    %33 = vector.broadcast %cst_16 : f32 to vector<8x800xf32>
    %34 = arith.maximumf %32, %33 : vector<8x800xf32>
    %35 = vector.extract_strided_slice %34 {offsets = [0, 0], sizes = [8, 200], strides = [1, 1]} : vector<8x800xf32> to vector<8x200xf32>
    %36 = vector.extract_strided_slice %34 {offsets = [0, 200], sizes = [8, 200], strides = [1, 1]} : vector<8x800xf32> to vector<8x200xf32>
    %37 = arith.maximumf %35, %36 : vector<8x200xf32>
    %38 = vector.extract_strided_slice %34 {offsets = [0, 400], sizes = [8, 200], strides = [1, 1]} : vector<8x800xf32> to vector<8x200xf32>
    %39 = vector.extract_strided_slice %34 {offsets = [0, 600], sizes = [8, 200], strides = [1, 1]} : vector<8x800xf32> to vector<8x200xf32>
    %40 = arith.maximumf %38, %39 : vector<8x200xf32>
    %41 = arith.maximumf %37, %40 : vector<8x200xf32>
    %42 = vector.extract_strided_slice %6 {offsets = [0, 0], sizes = [1, 200], strides = [1, 1]} : vector<1x800xf32> to vector<1x200xf32>
    %43 = vector.broadcast %42 : vector<1x200xf32> to vector<8x200xf32>
    %44 = arith.mulf %41, %43 : vector<8x200xf32>
    %c0_17 = arith.constant 0 : index
    %c0_18 = arith.constant 0 : index
    %c0_19 = arith.constant 0 : index
    %45 = vector.load %arg6[%c0_17, %c0_18, %c0_19] : memref<9x16x8xf32, #tpu.memory_space<vmem>>, vector<1x16x8xf32>
    %46 = vector.shape_cast %45 : vector<1x16x8xf32> to vector<16x8xf32>
    %47 = vector.extract_strided_slice %44 {offsets = [0, 0], sizes = [8, 178], strides = [1, 1]} : vector<8x200xf32> to vector<8x178xf32>
    %cst_20 = arith.constant dense<0.000000e+00> : vector<16x178xf32>
    %48 = tpu.matmul %46, %47, %cst_20 {dimension_numbers = #tpu.dot_dimension_numbers<[1], [0], [0], [1], [0, 0, 1, 1], [], []>} : vector<16x8xf32>, vector<8x178xf32>, vector<16x178xf32> -> vector<16x178xf32>
    %c1 = arith.constant 1 : index
    %c0_21 = arith.constant 0 : index
    %c0_22 = arith.constant 0 : index
    %49 = vector.load %arg6[%c1, %c0_21, %c0_22] : memref<9x16x8xf32, #tpu.memory_space<vmem>>, vector<1x16x8xf32>
    %50 = vector.shape_cast %49 : vector<1x16x8xf32> to vector<16x8xf32>
    %51 = vector.extract_strided_slice %44 {offsets = [0, 1], sizes = [8, 178], strides = [1, 1]} : vector<8x200xf32> to vector<8x178xf32>
    %cst_23 = arith.constant dense<0.000000e+00> : vector<16x178xf32>
    %52 = tpu.matmul %50, %51, %cst_23 {dimension_numbers = #tpu.dot_dimension_numbers<[1], [0], [0], [1], [0, 0, 1, 1], [], []>} : vector<16x8xf32>, vector<8x178xf32>, vector<16x178xf32> -> vector<16x178xf32>
    %53 = arith.addf %48, %52 : vector<16x178xf32>
    %c2 = arith.constant 2 : index
    %c0_24 = arith.constant 0 : index
    %c0_25 = arith.constant 0 : index
    %54 = vector.load %arg6[%c2, %c0_24, %c0_25] : memref<9x16x8xf32, #tpu.memory_space<vmem>>, vector<1x16x8xf32>
    %55 = vector.shape_cast %54 : vector<1x16x8xf32> to vector<16x8xf32>
    %56 = vector.extract_strided_slice %44 {offsets = [0, 2], sizes = [8, 178], strides = [1, 1]} : vector<8x200xf32> to vector<8x178xf32>
    %cst_26 = arith.constant dense<0.000000e+00> : vector<16x178xf32>
    %57 = tpu.matmul %55, %56, %cst_26 {dimension_numbers = #tpu.dot_dimension_numbers<[1], [0], [0], [1], [0, 0, 1, 1], [], []>} : vector<16x8xf32>, vector<8x178xf32>, vector<16x178xf32> -> vector<16x178xf32>
    %58 = arith.addf %53, %57 : vector<16x178xf32>
    %c3 = arith.constant 3 : index
    %c0_27 = arith.constant 0 : index
    %c0_28 = arith.constant 0 : index
    %59 = vector.load %arg6[%c3, %c0_27, %c0_28] : memref<9x16x8xf32, #tpu.memory_space<vmem>>, vector<1x16x8xf32>
    %60 = vector.shape_cast %59 : vector<1x16x8xf32> to vector<16x8xf32>
    %61 = vector.extract_strided_slice %44 {offsets = [0, 10], sizes = [8, 178], strides = [1, 1]} : vector<8x200xf32> to vector<8x178xf32>
    %cst_29 = arith.constant dense<0.000000e+00> : vector<16x178xf32>
    %62 = tpu.matmul %60, %61, %cst_29 {dimension_numbers = #tpu.dot_dimension_numbers<[1], [0], [0], [1], [0, 0, 1, 1], [], []>} : vector<16x8xf32>, vector<8x178xf32>, vector<16x178xf32> -> vector<16x178xf32>
    %63 = arith.addf %58, %62 : vector<16x178xf32>
    %c4 = arith.constant 4 : index
    %c0_30 = arith.constant 0 : index
    %c0_31 = arith.constant 0 : index
    %64 = vector.load %arg6[%c4, %c0_30, %c0_31] : memref<9x16x8xf32, #tpu.memory_space<vmem>>, vector<1x16x8xf32>
    %65 = vector.shape_cast %64 : vector<1x16x8xf32> to vector<16x8xf32>
    %66 = vector.extract_strided_slice %44 {offsets = [0, 11], sizes = [8, 178], strides = [1, 1]} : vector<8x200xf32> to vector<8x178xf32>
    %cst_32 = arith.constant dense<0.000000e+00> : vector<16x178xf32>
    %67 = tpu.matmul %65, %66, %cst_32 {dimension_numbers = #tpu.dot_dimension_numbers<[1], [0], [0], [1], [0, 0, 1, 1], [], []>} : vector<16x8xf32>, vector<8x178xf32>, vector<16x178xf32> -> vector<16x178xf32>
    %68 = arith.addf %63, %67 : vector<16x178xf32>
    %c5 = arith.constant 5 : index
    %c0_33 = arith.constant 0 : index
    %c0_34 = arith.constant 0 : index
    %69 = vector.load %arg6[%c5, %c0_33, %c0_34] : memref<9x16x8xf32, #tpu.memory_space<vmem>>, vector<1x16x8xf32>
    %70 = vector.shape_cast %69 : vector<1x16x8xf32> to vector<16x8xf32>
    %71 = vector.extract_strided_slice %44 {offsets = [0, 12], sizes = [8, 178], strides = [1, 1]} : vector<8x200xf32> to vector<8x178xf32>
    %cst_35 = arith.constant dense<0.000000e+00> : vector<16x178xf32>
    %72 = tpu.matmul %70, %71, %cst_35 {dimension_numbers = #tpu.dot_dimension_numbers<[1], [0], [0], [1], [0, 0, 1, 1], [], []>} : vector<16x8xf32>, vector<8x178xf32>, vector<16x178xf32> -> vector<16x178xf32>
    %73 = arith.addf %68, %72 : vector<16x178xf32>
    %c6 = arith.constant 6 : index
    %c0_36 = arith.constant 0 : index
    %c0_37 = arith.constant 0 : index
    %74 = vector.load %arg6[%c6, %c0_36, %c0_37] : memref<9x16x8xf32, #tpu.memory_space<vmem>>, vector<1x16x8xf32>
    %75 = vector.shape_cast %74 : vector<1x16x8xf32> to vector<16x8xf32>
    %76 = vector.extract_strided_slice %44 {offsets = [0, 20], sizes = [8, 178], strides = [1, 1]} : vector<8x200xf32> to vector<8x178xf32>
    %cst_38 = arith.constant dense<0.000000e+00> : vector<16x178xf32>
    %77 = tpu.matmul %75, %76, %cst_38 {dimension_numbers = #tpu.dot_dimension_numbers<[1], [0], [0], [1], [0, 0, 1, 1], [], []>} : vector<16x8xf32>, vector<8x178xf32>, vector<16x178xf32> -> vector<16x178xf32>
    %78 = arith.addf %73, %77 : vector<16x178xf32>
    %c7 = arith.constant 7 : index
    %c0_39 = arith.constant 0 : index
    %c0_40 = arith.constant 0 : index
    %79 = vector.load %arg6[%c7, %c0_39, %c0_40] : memref<9x16x8xf32, #tpu.memory_space<vmem>>, vector<1x16x8xf32>
    %80 = vector.shape_cast %79 : vector<1x16x8xf32> to vector<16x8xf32>
    %81 = vector.extract_strided_slice %44 {offsets = [0, 21], sizes = [8, 178], strides = [1, 1]} : vector<8x200xf32> to vector<8x178xf32>
    %cst_41 = arith.constant dense<0.000000e+00> : vector<16x178xf32>
    %82 = tpu.matmul %80, %81, %cst_41 {dimension_numbers = #tpu.dot_dimension_numbers<[1], [0], [0], [1], [0, 0, 1, 1], [], []>} : vector<16x8xf32>, vector<8x178xf32>, vector<16x178xf32> -> vector<16x178xf32>
    %83 = arith.addf %78, %82 : vector<16x178xf32>
    %c8 = arith.constant 8 : index
    %c0_42 = arith.constant 0 : index
    %c0_43 = arith.constant 0 : index
    %84 = vector.load %arg6[%c8, %c0_42, %c0_43] : memref<9x16x8xf32, #tpu.memory_space<vmem>>, vector<1x16x8xf32>
    %85 = vector.shape_cast %84 : vector<1x16x8xf32> to vector<16x8xf32>
    %86 = vector.extract_strided_slice %44 {offsets = [0, 22], sizes = [8, 178], strides = [1, 1]} : vector<8x200xf32> to vector<8x178xf32>
    %cst_44 = arith.constant dense<0.000000e+00> : vector<16x178xf32>
    %87 = tpu.matmul %85, %86, %cst_44 {dimension_numbers = #tpu.dot_dimension_numbers<[1], [0], [0], [1], [0, 0, 1, 1], [], []>} : vector<16x8xf32>, vector<8x178xf32>, vector<16x178xf32> -> vector<16x178xf32>
    %88 = arith.addf %83, %87 : vector<16x178xf32>
    %c0_45 = arith.constant 0 : index
    %c0_46 = arith.constant 0 : index
    %89 = vector.load %arg7[%c0_45, %c0_46] : memref<16x1xf32, #tpu.memory_space<vmem>>, vector<16x1xf32>
    %90 = vector.broadcast %89 : vector<16x1xf32> to vector<16x178xf32>
    %91 = arith.addf %88, %90 : vector<16x178xf32>
    %cst_47 = arith.constant 0.000000e+00 : f32
    %92 = vector.broadcast %cst_47 : f32 to vector<16x178xf32>
    %93 = arith.maximumf %91, %92 : vector<16x178xf32>
    %c0_48 = arith.constant 0 : index
    %c0_49 = arith.constant 0 : index
    %94 = vector.load %arg8[%c0_48, %c0_49] : memref<178x32xf32, #tpu.memory_space<vmem>>, vector<178x32xf32>
    %cst_50 = arith.constant dense<0.000000e+00> : vector<16x32xf32>
    %95 = tpu.matmul %93, %94, %cst_50 {dimension_numbers = #tpu.dot_dimension_numbers<[1], [0], [0], [1], [0, 0, 1, 1], [], []>} : vector<16x178xf32>, vector<178x32xf32>, vector<16x32xf32> -> vector<16x32xf32>
    %c0_51 = arith.constant 0 : index
    %c0_52 = arith.constant 0 : index
    %c0_53 = arith.constant 0 : index
    %96 = vector.load %arg9[%c0_51, %c0_52, %c0_53] : memref<16x10x16xf32, #tpu.memory_space<vmem>>, vector<1x10x16xf32>
    %97 = vector.shape_cast %96 : vector<1x10x16xf32> to vector<10x16xf32>
    %98 = vector.extract_strided_slice %95 {offsets = [0, 0], sizes = [16, 2], strides = [1, 1]} : vector<16x32xf32> to vector<16x2xf32>
    %cst_54 = arith.constant dense<0.000000e+00> : vector<10x2xf32>
    %99 = tpu.matmul %97, %98, %cst_54 {dimension_numbers = #tpu.dot_dimension_numbers<[1], [0], [0], [1], [0, 0, 1, 1], [], []>} : vector<10x16xf32>, vector<16x2xf32>, vector<10x2xf32> -> vector<10x2xf32>
    %c1_55 = arith.constant 1 : index
    %c0_56 = arith.constant 0 : index
    %c0_57 = arith.constant 0 : index
    %100 = vector.load %arg9[%c1_55, %c0_56, %c0_57] : memref<16x10x16xf32, #tpu.memory_space<vmem>>, vector<1x10x16xf32>
    %101 = vector.shape_cast %100 : vector<1x10x16xf32> to vector<10x16xf32>
    %102 = vector.extract_strided_slice %95 {offsets = [0, 2], sizes = [16, 2], strides = [1, 1]} : vector<16x32xf32> to vector<16x2xf32>
    %cst_58 = arith.constant dense<0.000000e+00> : vector<10x2xf32>
    %103 = tpu.matmul %101, %102, %cst_58 {dimension_numbers = #tpu.dot_dimension_numbers<[1], [0], [0], [1], [0, 0, 1, 1], [], []>} : vector<10x16xf32>, vector<16x2xf32>, vector<10x2xf32> -> vector<10x2xf32>
    %104 = arith.addf %99, %103 : vector<10x2xf32>
    %c2_59 = arith.constant 2 : index
    %c0_60 = arith.constant 0 : index
    %c0_61 = arith.constant 0 : index
    %105 = vector.load %arg9[%c2_59, %c0_60, %c0_61] : memref<16x10x16xf32, #tpu.memory_space<vmem>>, vector<1x10x16xf32>
    %106 = vector.shape_cast %105 : vector<1x10x16xf32> to vector<10x16xf32>
    %107 = vector.extract_strided_slice %95 {offsets = [0, 4], sizes = [16, 2], strides = [1, 1]} : vector<16x32xf32> to vector<16x2xf32>
    %cst_62 = arith.constant dense<0.000000e+00> : vector<10x2xf32>
    %108 = tpu.matmul %106, %107, %cst_62 {dimension_numbers = #tpu.dot_dimension_numbers<[1], [0], [0], [1], [0, 0, 1, 1], [], []>} : vector<10x16xf32>, vector<16x2xf32>, vector<10x2xf32> -> vector<10x2xf32>
    %109 = arith.addf %104, %108 : vector<10x2xf32>
    %c3_63 = arith.constant 3 : index
    %c0_64 = arith.constant 0 : index
    %c0_65 = arith.constant 0 : index
    %110 = vector.load %arg9[%c3_63, %c0_64, %c0_65] : memref<16x10x16xf32, #tpu.memory_space<vmem>>, vector<1x10x16xf32>
    %111 = vector.shape_cast %110 : vector<1x10x16xf32> to vector<10x16xf32>
    %112 = vector.extract_strided_slice %95 {offsets = [0, 6], sizes = [16, 2], strides = [1, 1]} : vector<16x32xf32> to vector<16x2xf32>
    %cst_66 = arith.constant dense<0.000000e+00> : vector<10x2xf32>
    %113 = tpu.matmul %111, %112, %cst_66 {dimension_numbers = #tpu.dot_dimension_numbers<[1], [0], [0], [1], [0, 0, 1, 1], [], []>} : vector<10x16xf32>, vector<16x2xf32>, vector<10x2xf32> -> vector<10x2xf32>
    %114 = arith.addf %109, %113 : vector<10x2xf32>
    %c4_67 = arith.constant 4 : index
    %c0_68 = arith.constant 0 : index
    %c0_69 = arith.constant 0 : index
    %115 = vector.load %arg9[%c4_67, %c0_68, %c0_69] : memref<16x10x16xf32, #tpu.memory_space<vmem>>, vector<1x10x16xf32>
    %116 = vector.shape_cast %115 : vector<1x10x16xf32> to vector<10x16xf32>
    %117 = vector.extract_strided_slice %95 {offsets = [0, 8], sizes = [16, 2], strides = [1, 1]} : vector<16x32xf32> to vector<16x2xf32>
    %cst_70 = arith.constant dense<0.000000e+00> : vector<10x2xf32>
    %118 = tpu.matmul %116, %117, %cst_70 {dimension_numbers = #tpu.dot_dimension_numbers<[1], [0], [0], [1], [0, 0, 1, 1], [], []>} : vector<10x16xf32>, vector<16x2xf32>, vector<10x2xf32> -> vector<10x2xf32>
    %119 = arith.addf %114, %118 : vector<10x2xf32>
    %c5_71 = arith.constant 5 : index
    %c0_72 = arith.constant 0 : index
    %c0_73 = arith.constant 0 : index
    %120 = vector.load %arg9[%c5_71, %c0_72, %c0_73] : memref<16x10x16xf32, #tpu.memory_space<vmem>>, vector<1x10x16xf32>
    %121 = vector.shape_cast %120 : vector<1x10x16xf32> to vector<10x16xf32>
    %122 = vector.extract_strided_slice %95 {offsets = [0, 10], sizes = [16, 2], strides = [1, 1]} : vector<16x32xf32> to vector<16x2xf32>
    %cst_74 = arith.constant dense<0.000000e+00> : vector<10x2xf32>
    %123 = tpu.matmul %121, %122, %cst_74 {dimension_numbers = #tpu.dot_dimension_numbers<[1], [0], [0], [1], [0, 0, 1, 1], [], []>} : vector<10x16xf32>, vector<16x2xf32>, vector<10x2xf32> -> vector<10x2xf32>
    %124 = arith.addf %119, %123 : vector<10x2xf32>
    %c6_75 = arith.constant 6 : index
    %c0_76 = arith.constant 0 : index
    %c0_77 = arith.constant 0 : index
    %125 = vector.load %arg9[%c6_75, %c0_76, %c0_77] : memref<16x10x16xf32, #tpu.memory_space<vmem>>, vector<1x10x16xf32>
    %126 = vector.shape_cast %125 : vector<1x10x16xf32> to vector<10x16xf32>
    %127 = vector.extract_strided_slice %95 {offsets = [0, 12], sizes = [16, 2], strides = [1, 1]} : vector<16x32xf32> to vector<16x2xf32>
    %cst_78 = arith.constant dense<0.000000e+00> : vector<10x2xf32>
    %128 = tpu.matmul %126, %127, %cst_78 {dimension_numbers = #tpu.dot_dimension_numbers<[1], [0], [0], [1], [0, 0, 1, 1], [], []>} : vector<10x16xf32>, vector<16x2xf32>, vector<10x2xf32> -> vector<10x2xf32>
    %129 = arith.addf %124, %128 : vector<10x2xf32>
    %c7_79 = arith.constant 7 : index
    %c0_80 = arith.constant 0 : index
    %c0_81 = arith.constant 0 : index
    %130 = vector.load %arg9[%c7_79, %c0_80, %c0_81] : memref<16x10x16xf32, #tpu.memory_space<vmem>>, vector<1x10x16xf32>
    %131 = vector.shape_cast %130 : vector<1x10x16xf32> to vector<10x16xf32>
    %132 = vector.extract_strided_slice %95 {offsets = [0, 14], sizes = [16, 2], strides = [1, 1]} : vector<16x32xf32> to vector<16x2xf32>
    %cst_82 = arith.constant dense<0.000000e+00> : vector<10x2xf32>
    %133 = tpu.matmul %131, %132, %cst_82 {dimension_numbers = #tpu.dot_dimension_numbers<[1], [0], [0], [1], [0, 0, 1, 1], [], []>} : vector<10x16xf32>, vector<16x2xf32>, vector<10x2xf32> -> vector<10x2xf32>
    %134 = arith.addf %129, %133 : vector<10x2xf32>
    %c8_83 = arith.constant 8 : index
    %c0_84 = arith.constant 0 : index
    %c0_85 = arith.constant 0 : index
    %135 = vector.load %arg9[%c8_83, %c0_84, %c0_85] : memref<16x10x16xf32, #tpu.memory_space<vmem>>, vector<1x10x16xf32>
    %136 = vector.shape_cast %135 : vector<1x10x16xf32> to vector<10x16xf32>
    %137 = vector.extract_strided_slice %95 {offsets = [0, 16], sizes = [16, 2], strides = [1, 1]} : vector<16x32xf32> to vector<16x2xf32>
    %cst_86 = arith.constant dense<0.000000e+00> : vector<10x2xf32>
    %138 = tpu.matmul %136, %137, %cst_86 {dimension_numbers = #tpu.dot_dimension_numbers<[1], [0], [0], [1], [0, 0, 1, 1], [], []>} : vector<10x16xf32>, vector<16x2xf32>, vector<10x2xf32> -> vector<10x2xf32>
    %139 = arith.addf %134, %138 : vector<10x2xf32>
    %c9 = arith.constant 9 : index
    %c0_87 = arith.constant 0 : index
    %c0_88 = arith.constant 0 : index
    %140 = vector.load %arg9[%c9, %c0_87, %c0_88] : memref<16x10x16xf32, #tpu.memory_space<vmem>>, vector<1x10x16xf32>
    %141 = vector.shape_cast %140 : vector<1x10x16xf32> to vector<10x16xf32>
    %142 = vector.extract_strided_slice %95 {offsets = [0, 18], sizes = [16, 2], strides = [1, 1]} : vector<16x32xf32> to vector<16x2xf32>
    %cst_89 = arith.constant dense<0.000000e+00> : vector<10x2xf32>
    %143 = tpu.matmul %141, %142, %cst_89 {dimension_numbers = #tpu.dot_dimension_numbers<[1], [0], [0], [1], [0, 0, 1, 1], [], []>} : vector<10x16xf32>, vector<16x2xf32>, vector<10x2xf32> -> vector<10x2xf32>
    %144 = arith.addf %139, %143 : vector<10x2xf32>
    %c10 = arith.constant 10 : index
    %c0_90 = arith.constant 0 : index
    %c0_91 = arith.constant 0 : index
    %145 = vector.load %arg9[%c10, %c0_90, %c0_91] : memref<16x10x16xf32, #tpu.memory_space<vmem>>, vector<1x10x16xf32>
    %146 = vector.shape_cast %145 : vector<1x10x16xf32> to vector<10x16xf32>
    %147 = vector.extract_strided_slice %95 {offsets = [0, 20], sizes = [16, 2], strides = [1, 1]} : vector<16x32xf32> to vector<16x2xf32>
    %cst_92 = arith.constant dense<0.000000e+00> : vector<10x2xf32>
    %148 = tpu.matmul %146, %147, %cst_92 {dimension_numbers = #tpu.dot_dimension_numbers<[1], [0], [0], [1], [0, 0, 1, 1], [], []>} : vector<10x16xf32>, vector<16x2xf32>, vector<10x2xf32> -> vector<10x2xf32>
    %149 = arith.addf %144, %148 : vector<10x2xf32>
    %c11 = arith.constant 11 : index
    %c0_93 = arith.constant 0 : index
    %c0_94 = arith.constant 0 : index
    %150 = vector.load %arg9[%c11, %c0_93, %c0_94] : memref<16x10x16xf32, #tpu.memory_space<vmem>>, vector<1x10x16xf32>
    %151 = vector.shape_cast %150 : vector<1x10x16xf32> to vector<10x16xf32>
    %152 = vector.extract_strided_slice %95 {offsets = [0, 22], sizes = [16, 2], strides = [1, 1]} : vector<16x32xf32> to vector<16x2xf32>
    %cst_95 = arith.constant dense<0.000000e+00> : vector<10x2xf32>
    %153 = tpu.matmul %151, %152, %cst_95 {dimension_numbers = #tpu.dot_dimension_numbers<[1], [0], [0], [1], [0, 0, 1, 1], [], []>} : vector<10x16xf32>, vector<16x2xf32>, vector<10x2xf32> -> vector<10x2xf32>
    %154 = arith.addf %149, %153 : vector<10x2xf32>
    %c12 = arith.constant 12 : index
    %c0_96 = arith.constant 0 : index
    %c0_97 = arith.constant 0 : index
    %155 = vector.load %arg9[%c12, %c0_96, %c0_97] : memref<16x10x16xf32, #tpu.memory_space<vmem>>, vector<1x10x16xf32>
    %156 = vector.shape_cast %155 : vector<1x10x16xf32> to vector<10x16xf32>
    %157 = vector.extract_strided_slice %95 {offsets = [0, 24], sizes = [16, 2], strides = [1, 1]} : vector<16x32xf32> to vector<16x2xf32>
    %cst_98 = arith.constant dense<0.000000e+00> : vector<10x2xf32>
    %158 = tpu.matmul %156, %157, %cst_98 {dimension_numbers = #tpu.dot_dimension_numbers<[1], [0], [0], [1], [0, 0, 1, 1], [], []>} : vector<10x16xf32>, vector<16x2xf32>, vector<10x2xf32> -> vector<10x2xf32>
    %159 = arith.addf %154, %158 : vector<10x2xf32>
    %c13 = arith.constant 13 : index
    %c0_99 = arith.constant 0 : index
    %c0_100 = arith.constant 0 : index
    %160 = vector.load %arg9[%c13, %c0_99, %c0_100] : memref<16x10x16xf32, #tpu.memory_space<vmem>>, vector<1x10x16xf32>
    %161 = vector.shape_cast %160 : vector<1x10x16xf32> to vector<10x16xf32>
    %162 = vector.extract_strided_slice %95 {offsets = [0, 26], sizes = [16, 2], strides = [1, 1]} : vector<16x32xf32> to vector<16x2xf32>
    %cst_101 = arith.constant dense<0.000000e+00> : vector<10x2xf32>
    %163 = tpu.matmul %161, %162, %cst_101 {dimension_numbers = #tpu.dot_dimension_numbers<[1], [0], [0], [1], [0, 0, 1, 1], [], []>} : vector<10x16xf32>, vector<16x2xf32>, vector<10x2xf32> -> vector<10x2xf32>
    %164 = arith.addf %159, %163 : vector<10x2xf32>
    %c14 = arith.constant 14 : index
    %c0_102 = arith.constant 0 : index
    %c0_103 = arith.constant 0 : index
    %165 = vector.load %arg9[%c14, %c0_102, %c0_103] : memref<16x10x16xf32, #tpu.memory_space<vmem>>, vector<1x10x16xf32>
    %166 = vector.shape_cast %165 : vector<1x10x16xf32> to vector<10x16xf32>
    %167 = vector.extract_strided_slice %95 {offsets = [0, 28], sizes = [16, 2], strides = [1, 1]} : vector<16x32xf32> to vector<16x2xf32>
    %cst_104 = arith.constant dense<0.000000e+00> : vector<10x2xf32>
    %168 = tpu.matmul %166, %167, %cst_104 {dimension_numbers = #tpu.dot_dimension_numbers<[1], [0], [0], [1], [0, 0, 1, 1], [], []>} : vector<10x16xf32>, vector<16x2xf32>, vector<10x2xf32> -> vector<10x2xf32>
    %169 = arith.addf %164, %168 : vector<10x2xf32>
    %c15 = arith.constant 15 : index
    %c0_105 = arith.constant 0 : index
    %c0_106 = arith.constant 0 : index
    %170 = vector.load %arg9[%c15, %c0_105, %c0_106] : memref<16x10x16xf32, #tpu.memory_space<vmem>>, vector<1x10x16xf32>
    %171 = vector.shape_cast %170 : vector<1x10x16xf32> to vector<10x16xf32>
    %172 = vector.extract_strided_slice %95 {offsets = [0, 30], sizes = [16, 2], strides = [1, 1]} : vector<16x32xf32> to vector<16x2xf32>
    %cst_107 = arith.constant dense<0.000000e+00> : vector<10x2xf32>
    %173 = tpu.matmul %171, %172, %cst_107 {dimension_numbers = #tpu.dot_dimension_numbers<[1], [0], [0], [1], [0, 0, 1, 1], [], []>} : vector<10x16xf32>, vector<16x2xf32>, vector<10x2xf32> -> vector<10x2xf32>
    %174 = arith.addf %169, %173 : vector<10x2xf32>
    %c0_108 = arith.constant 0 : index
    %c0_109 = arith.constant 0 : index
    %175 = vector.load %arg10[%c0_108, %c0_109] : memref<10x1xf32, #tpu.memory_space<vmem>>, vector<10x1xf32>
    %176 = vector.broadcast %175 : vector<10x1xf32> to vector<10x2xf32>
    %177 = arith.addf %174, %176 : vector<10x2xf32>
    %c0_110 = arith.constant 0 : index
    %c0_111 = arith.constant 0 : index
    %178 = vector.load %arg11[%c0_110, %c0_111] : memref<10x2xf32, #tpu.memory_space<vmem>>, vector<10x2xf32>
    tpu.vector_store %arg11[%c0_110, %c0_111], %177 {strides = array<i32>} : memref<10x2xf32, #tpu.memory_space<vmem>>, vector<10x2xf32>,
    return
  }
}

</mosaic_0001>

<bundles_post_ra>
// kernel: cnn_forward.1
= control target key start
LH: loop header
LB: loop body
LE: loop exit
PB: predicated region body
PF: predicated region fallthrough
CT: control target
= control target key end

     0   :  { %v3641_v3 = vmov 0.0   ;;  %v3642_v4 = vmov 0.0|0.0   ;;  %v3643_v9 = vmov 0   ;;  %vm84_vm0 = vcmask 1043456   ;;  %s3646_s14 = smov 112   ;;  %s3647_s15 = smov 127   ;;  %s4235_s0 = inlined_call_operand.vmem [shape: f32[36,800], index: 0, kind: input, shape index: {}]   ;;  %s4236_s1 = inlined_call_operand.vmem [shape: f32[8,36], index: 1, kind: input, shape index: {}]   ;;  %s4237_s2 = inlined_call_operand.vmem [shape: f32[8,1], index: 2, kind: input, shape index: {}]   ;;  %s4238_s3 = inlined_call_operand.vmem [shape: f32[8,1], index: 3, kind: input, shape index: {}]   ;;  %s4239_s5 = inlined_call_operand.vmem [shape: f32[1,800], index: 5, kind: input, shape index: {}]   ;;  %s4240_s4 = inlined_call_operand.vmem [shape: f32[8,1], index: 4, kind: input, shape index: {}]   ;;  %s4241_s7 = inlined_call_operand.vmem [shape: f32[16,1], index: 7, kind: input, shape index: {}]   ;;  %s4242_s8 = inlined_call_operand.vmem [shape: f32[178,32], index: 8, kind: input, shape index: {}]   ;;  %s4243_s6 = inlined_call_operand.vmem [shape: f32[9,16,8], index: 6, kind: input, shape index: {}]   ;;  %s4244_s9 = inlined_call_operand.vmem [shape: f32[16,10,16], index: 9, kind: input, shape index: {}]   ;;  %s4245_s10 = inlined_call_operand.vmem [shape: f32[10,1], index: 10, kind: input, shape index: {}]   ;;  %s4246_s11 = inlined_call_operand.vmem [shape: f32[10,2], index: 11, kind: output, shape index: {}]  }
   0x1   :  { %v40_v0 = vld [vmem:[%s4235_s0 + $0x8] sm:$0xff]  ;;  %v47_v1 = vld [vmem:[%s4235_s0 + $0x40] sm:$0xff]  ;;  %170 = vmatprep.mubr.f32.mxu0 %v3641_v3  ;;  %3380 = vmatprep.subr.bf16.mxu1 %v3642_v4  ;;  %v46_v6 = vld [vmem:[%s4235_s0 + $0x38] sm:$0xff]  ;;  %vm80_vm1 = vcmask 293888   ;;  %vm3644_vm2 = vmmov 0   ;;  %v391_v57 = vlaneseq  ;;  %vm438_vm3 = vcmask 261120  }
   0x2   :  { %v39_v2 = vld [vmem:[%s4235_s0] sm:$0xff]  ;;  %v3350_v5 = vpack.c.bf16 %v47_v1, %v40_v0  ;;  %v54_v7 = vld [vmem:[%s4235_s0 + $0x78] sm:$0xff]  ;;  %v61_v8 = vld [vmem:[%s4235_s0 + $0xb0] sm:$0xff]  ;;  %3562 = vset.pattern.permute.xlu0 %v3643_v9  ;;  %3563 = vset.pattern.permute.xlu1 %v3643_v9  ;;  %vm526_vm4 = vcmask 457728   ;;  %vm554_vm5 = vcmask 916480   ;;  %s3648_s16 = smov 126  }
   0x3   :  { %v3352_v10 = vpack.c.bf16 %v46_v6, %v39_v2  ;;  %v3354_v11 = vpack.c.bf16 %v61_v8, %v54_v7  ;;  %v53_v12 = vld [vmem:[%s4235_s0 + $0x70] sm:$0xff]  ;;  %v60_v13 = vld [vmem:[%s4235_s0 + $0xa8] sm:$0xff]  ;;  %v42_v16 = vld [vmem:[%s4235_s0 + $0x18] sm:$0xff]  ;;  %v392_v58 = vshrl.u32 %v391_v57, 7  ;;  %s3649_s17 = smov 118   ;;  %s3650_s18 = smov 117  }
   0x4   :  { %3351 = vmatprep.subr.bf16.mxu0 %v3350_v5  ;;  %v3356_v14 = vpack.c.bf16 %v60_v13, %v53_v12  ;;  %v68_v15 = vld [vmem:[%s4235_s0 + $0xe8] sm:$0xf]  ;;  %v49_v17 = vld [vmem:[%s4235_s0 + $0x50] sm:$0xff]  ;;  %v63_v21 = vld [vmem:[%s4235_s0 + $0xc0] sm:$0xff]  ;;  %s3652_s19 = smov 108   ;;  %s3653_s20 = smov 107  }
   0x5   :  { %3353 = vmatpush1.bf16.msra.mxu0 %v3352_v10  ;;  %v41_v18 = vld [vmem:[%s4235_s0 + $0x10] sm:$0xff]  ;;  %v48_v19 = vld [vmem:[%s4235_s0 + $0x48] sm:$0xff]  ;;  %v67_v22 = vld [vmem:[%s4235_s0 + $0xe0] sm:$0xf]  ;;  %v3358_v23 = vpack.c.bf16 %v49_v17, %v42_v16  ;;  %v393_v59 = vsub.s32 0, %v392_v58  ;;  %v397_v60 = vsub.s32 1, %v392_v58 }
   0x6   :  { %3355 = vmatprep.subr.bf16.mxu0 %v3354_v11  ;;  %v56_v20 = vld [vmem:[%s4235_s0 + $0x88] sm:$0xff]  ;;  %v38_v24 = vld [vmem:[%s4236_s1] sm:$0xff]  ;;  %v3360_v25 = vpack.c.bf16 %v48_v19, %v41_v18  ;;  %v62_v28 = vld [vmem:[%s4235_s0 + $0xb8] sm:$0xff]  ;;  %v401_v1 = vsub.s32 2, %v392_v58  ;;  %v405_v10 = vsub.s32 3, %v392_v58  ;;  %v409_v13 = vsub.s32 4, %v392_v58 }
   0x7   :  { %v3362_v26 = vpack.c.bf16 %v63_v21, %v56_v20  ;;  %v55_v27 = vld [vmem:[%s4235_s0 + $0x80] sm:$0xff]  ;;  %v70_v31 = vld [vmem:[%s4235_s0 + $0xf8] sm:$0xf]  ;;  %v44_v32 = vld [vmem:[%s4235_s0 + $0x28] sm:$0xff]  ;;  %s3651_s1 = smov 116   ;;  %s3654_s21 = smov 106  }
   0x8   :  { %v74_v29 = vld [vmem:[%s4237_s2] sm:$0xff]  ;;  %v3364_v30 = vpack.c.bf16 %v62_v28, %v55_v27  ;;  %v50_v35 = vld [vmem:[%s4235_s0 + $0x58] sm:$0xff]  ;;  %v65_v37 = vld [vmem:[%s4235_s0 + $0xd0] sm:$0xff]  ;;  %vm573_vm6 = vcmask 1039360   ;;  %vm577_vm7 = vcmask 64512   ;;  %vm751_vm8 = vcmask 1031168  }
   0x9   :  { %3357 = vmatpush1.bf16.msra.mxu0 %v3356_v14  ;;  %77 = vperm.xlu0 %3562, %v74_v29   ;;  %v51_v33 = vld [vmem:[%s4235_s0 + $0x60] sm:$0xff]  ;;  %v58_v36 = vld [vmem:[%s4235_s0 + $0x98] sm:$0xff]  ;;  %v69_v38 = vld [vmem:[%s4235_s0 + $0xf0] sm:$0xf]  ;;  %vm849_vm9 = vcmask 965632   ;;  %vm947_vm10 = vcmask 957440  }
   0xa   :  { %3045 = vmatprep.subr.msk.mxu0 %vm84_vm0, %v68_v15  ;;  %v43_v34 = vld [vmem:[%s4235_s0 + $0x20] sm:$0xff]  ;;  %v3366_v39 = vpack.c.bf16 %v51_v33, %v44_v32  ;;  %v3370_v41 = vpack.c.bf16 %v65_v37, %v58_v36  ;;  %v57_v42 = vld [vmem:[%s4235_s0 + $0x90] sm:$0xff]  ;;  %v64_v43 = vld [vmem:[%s4235_s0 + $0xc8] sm:$0xff]  ;;  %vm1045_vm11 = vcmask 949248   ;;  %vm1143_vm12 = vcmask 883712   ;;  %s3655_s27 = smov 124  }
   0xb   :  { %v3368_v40 = vpack.c.bf16 %v50_v35, %v43_v34  ;;  %v3372_v44 = vpack.c.bf16 %v64_v43, %v57_v42  ;;  %v72_v45 = vld [vmem:[%s4235_s0 + $0x108] sm:$0xf]  ;;  %v45_v46 = vld [vmem:[%s4235_s0 + $0x30] sm:$0xff]  ;;  %v71_v48 = vld [vmem:[%s4235_s0 + $0x100] sm:$0xf]  ;;  %vm1241_vm13 = vcmask 875520  }
   0xc   :  { %v52_v47 = vld [vmem:[%s4235_s0 + $0x68] sm:$0xff]  ;;  %v59_v50 = vld [vmem:[%s4235_s0 + $0xa0] sm:$0xff]  ;;  %v66_v51 = vld [vmem:[%s4235_s0 + $0xd8] sm:$0xff]  ;;  %vm1339_vm14 = vcmask 867328   ;;  %vm1480_vm15 = vcmask 1041408   ;;  %s3656_s28 = smov 120  }
   0xd   :  { %3046 = vmatpush1.msk.msra.mxu0 %vm84_vm0, %v67_v22  ;;  %v3375_v49 = vpack.c.bf16 %v52_v47, %v45_v46  ;;  %v3378_v52 = vpack.c.bf16 %v66_v51, %v59_v50  ;;  %v73_v53 = vld [vmem:[%s4235_s0 + $0x110] sm:$0xf]  ;;  %v484_v54 = vld [vmem:[%s4238_s3] sm:$0xff]  ;;  %v413_v22 = vsub.s32 5, %v392_v58  ;;  %s3657_s29 = smov 122   ;;  %s3658_s30 = smov 114  }
   0xe   :  { %3047 = vmatmul.mubr.msk.f32.vlgmr.msra.gmra.mrb[0].mxu0 %vm80_vm1, %v38_v24  ;;  %3359 = vmatprep.subr.bf16.mxu0 %v3358_v23  ;;  %v389_v63 = vld [vmem:[%s4239_s5] sm:$0x7f]  ;;  %s3659_s12 = smov 110   ;;  %s3660_s0 = smov 104  }
   0xf   :  { %3361 = vmatpush1.bf16.msra.mxu0 %v3360_v25  ;;  %241 = vmatprep.mubr.f32.mxu0 %v3641_v3  ;;  %v3861_v6 = vrot.slane %v389_v63, %v393_v59  ;;  %v3863_v7 = vrot.slane %v389_v63, %v397_v60  ;;  %v402_v9 = vrot.slane %v389_v63, %v401_v1  ;;  %v417_v25 = vsub.s32 6, %v392_v58 }
  0x10   :  { %3363 = vmatprep.subr.bf16.mxu0 %v3362_v26  ;;  %487 = vperm.xlu1 %3563, %v484_v54   ;;  %v406_v16 = vrot.slane %v389_v63, %v405_v10  ;;  %v410_v21 = vrot.slane %v389_v63, %v409_v13  ;;  %v414_v28 = vrot.slane %v389_v63, %v413_v22 }
  0x13   :  { %3365 = vmatpush1.bf16.msra.mxu0 %v3364_v30  ;;  %v418_v30 = vrot.slane %v389_v63, %v417_v25 }
  0x14   :  { %3048 = vmatprep.subr.msk.mxu0 %vm84_vm0, %v70_v31 }
  0x17   :  { %3049 = vmatpush1.msk.msra.mxu0 %vm84_vm0, %v69_v38 }
  0x18   :  { %3050 = vmatmul.mubr.msk.f32.vlgmr.msra.gmra.mrb[2].mxu0 %vm80_vm1, %v38_v24  ;;  %3367 = vmatprep.subr.bf16.mxu0 %v3366_v39 }
  0x19   :  { %3369 = vmatpush1.bf16.msra.mxu0 %v3368_v40  ;;  %312 = vmatprep.mubr.f32.mxu0 %v3641_v3 }
  0x1a   :  { %3371 = vmatprep.subr.bf16.mxu0 %v3370_v41 }
  0x1d   :  { %3373 = vmatpush1.bf16.msra.mxu0 %v3372_v44 }
  0x1e   :  { %3051 = vmatprep.subr.msk.mxu0 %vm84_vm0, %v72_v45 }
  0x21   :  { %3052 = vmatpush1.msk.msra.mxu0 %vm84_vm0, %v71_v48 }
  0x22   :  { %3053 = vmatmul.mubr.msk.f32.vlgmr.msra.gmra.mrb[4].mxu0 %vm80_vm1, %v38_v24  ;;  %3374 = vmatprep.subr.bf16.mxu0 %v3642_v4 }
  0x23   :  { %3376 = vmatpush3.bf16.msra.mxu0 %v3375_v49  ;;  %3235 = vmatprep.mubr.msk.f32.mxu0 %vm3644_vm2, %v3641_v3  ;;  %vm3039_vm2 = vcmask 9216  }
  0x24   :  { %3377 = vmatprep.subr.bf16.mxu0 %v3642_v4 }
  0x27   :  { %3379 = vmatpush3.bf16.msra.mxu0 %v3378_v52 }
  0x28   :  { %3233 = vmatprep.subr.mxu0 %v3641_v3 }
  0x2b   :  { %3234 = vmatpush3.msk.msra.mxu0 %vm84_vm0, %v73_v53  ;;  %vm1473_vm0 = vcmask 408576  }
  0x2c   :  { %3236 = vmatmul.mubr.msk.f32.vlgmr.msra.gmra.mrb[6].mxu0 %vm80_vm1, %v38_v24  ;;  %vm1572_vm1 = vcmask 130048  }
  0x2d   :  { %648 = vmatprep.mubr.f32.mxu0 %v3641_v3 }
  0x88   :  { %v78_v62 = vpop.permute.xlu0 %77 }
  0xe1   :  { %v172_v55 = vpop.f32.mrb[0].mxu0 }
  0xe2   :  { %v174_v56 = vpop.f32.mrb[1].mxu0  ;;  %v173_v2 = vadd.f32 %v172_v55, %v78_v62 }
  0xe3   :  { %v175_v5 = vadd.f32 %v174_v56, %v78_v62 }
  0xe4   :  { %v426_v11 = vmul.f32 %v3861_v6, %v173_v2 }
  0xe5   :  { %v427_v12 = vmul.f32 %v3863_v7, %v175_v5 }
  0xe7   :  { %v433_v19 = vadd.f32 %v427_v12, %v426_v11  ;;  %v497_v11 = vld [vmem:[%s4240_s4] sm:$0xff]  ;;  %s3645_s4 = smov 56  }
  0xeb   :  { %v243_v61 = vpop.f32.mrb[2].mxu0 }
  0xec   :  { %v245_v0 = vpop.f32.mrb[3].mxu0  ;;  %v244_v8 = vadd.f32 %v243_v61, %v78_v62 }
  0xed   :  { %v246_v15 = vadd.f32 %v245_v0, %v78_v62 }
  0xee   :  { %v428_v14 = vmul.f32 %v402_v9, %v244_v8 }
  0xef   :  { %v429_v24 = vmul.f32 %v406_v16, %v246_v15 }
  0xf0   :  { %v434_v23 = vadd.f32 %v433_v19, %v428_v14 }
  0xf2   :  { %v435_v29 = vadd.f32 %v434_v23, %v429_v24 }
  0xf5   :  { %v314_v17 = vpop.f32.mrb[4].mxu0 }
  0xf6   :  { %v316_v18 = vpop.f32.mrb[5].mxu0  ;;  %v315_v20 = vadd.f32 %v314_v17, %v78_v62 }
  0xf7   :  { %v317_v27 = vadd.f32 %v316_v18, %v78_v62 }
  0xf8   :  { %v430_v26 = vmul.f32 %v410_v21, %v315_v20 }
  0xf9   :  { %v431_v32 = vmul.f32 %v414_v28, %v317_v27 }
  0xfa   :  { %v436_v31 = vadd.f32 %v435_v29, %v430_v26 }
  0xfc   :  { %v437_v37 = vadd.f32 %v436_v31, %v431_v32 }
  0xff   :  { %v385_v33 = vpop.f32.mrb[6].mxu0 }
 0x100   :  { %v386_v34 = vadd.f32 %v385_v33, %v78_v62  ;;  %v3237_v35 = vpop.f32.mrb[7].mxu0 }
 0x102   :  { %v432_v36 = vmul.f32 %v418_v30, %v386_v34 }
 0x104   :  { %v439_v38 = vsel %vm438_vm3, %v432_v36, 0.0 }
 0x105   :  { %v440_v39 = vadd.f32 %v439_v38, %v437_v37 }
 0x107   :  { %441 = vadd.xlane.f32.xlu0 %v440_v39 }
 0x194   :  { %v442_v40 = vpop.xlane.xlu0 %441 }
 0x195   :  { %v443_v41 = vmul.f32 0.001953125, %v442_v40 }
 0x197   :  { %v444_v42 = vsub.f32 %v173_v2, %v443_v41  ;;  %v445_v43 = vsub.f32 %v175_v5, %v443_v41  ;;  %v446_v44 = vsub.f32 %v244_v8, %v443_v41  ;;  %v447_v45 = vsub.f32 %v246_v15, %v443_v41 }
 0x198   :  { %v448_v46 = vsub.f32 %v315_v20, %v443_v41  ;;  %v450_v50 = vsub.f32 %v386_v34, %v443_v41  ;;  %v449_v51 = vsub.f32 %v317_v27, %v443_v41 }
 0x199   :  { %v451_v47 = vmul.f32 %v444_v42, %v444_v42  ;;  %v452_v48 = vmul.f32 %v445_v43, %v445_v43  ;;  %v453_v49 = vmul.f32 %v446_v44, %v446_v44  ;;  %v454_v52 = vmul.f32 %v447_v45, %v447_v45 }
 0x19a   :  { %v455_v55 = vmul.f32 %v448_v46, %v448_v46  ;;  %v457_v58 = vmul.f32 %v450_v50, %v450_v50  ;;  %v456_v59 = vmul.f32 %v449_v51, %v449_v51 }
 0x19b   :  { %v458_v53 = vmul.f32 %v451_v47, %v3861_v6  ;;  %v459_v54 = vmul.f32 %v452_v48, %v3863_v7  ;;  %v460_v56 = vmul.f32 %v453_v49, %v402_v9  ;;  %v461_v60 = vmul.f32 %v454_v52, %v406_v16  ;;  %v488_v9 = vpop.permute.xlu1 %487 }
 0x19c   :  { %v462_v62 = vmul.f32 %v455_v55, %v410_v21  ;;  %v464_v0 = vmul.f32 %v457_v58, %v418_v30  ;;  %v463_v1 = vmul.f32 %v456_v59, %v414_v28 }
 0x19d   :  { %v465_v57 = vadd.f32 %v459_v54, %v458_v53 }
 0x19e   :  { %v470_v8 = vsel %vm438_vm3, %v464_v0, 0.0  ;;  %vm3037_vm3 = vcmask 15360  }
 0x19f   :  { %v466_v61 = vadd.f32 %v465_v57, %v460_v56 }
 0x1a1   :  { %v467_v63 = vadd.f32 %v466_v61, %v461_v60 }
 0x1a3   :  { %v468_v2 = vadd.f32 %v467_v63, %v462_v62 }
 0x1a5   :  { %v469_v5 = vadd.f32 %v468_v2, %v463_v1  ;;  %v1450_v2 = vld [vmem:[%s4242_s8] sm:$0xff] }
 0x1a7   :  { %v471_v10 = vadd.f32 %v470_v8, %v469_v5  ;;  %v1451_v5 = vld [vmem:[%s4242_s8 + $0x8] sm:$0xff]  ;;  %v1452_v8 = vld [vmem:[%s4242_s8 + $0x10] sm:$0xff] }
 0x1a9   :  { %472 = vadd.xlane.f32.xlu1 %v471_v10  ;;  %v3381_v10 = vpack.c.bf16 %v1451_v5, %v1450_v2 }
 0x1ab   :  { %3382 = vmatpush1.bf16.msra.mxu1 %v3381_v10 }
 0x1ac   :  { %3383 = vmatprep.subr.bf16.mxu1 %v3642_v4 }
 0x1ba   :  { %500 = vperm.xlu1 %3563, %v497_v11   ;;  %v1453_v11 = vld [vmem:[%s4242_s8 + $0x18] sm:$0xff] }
 0x236   :  { %v473_v12 = vpop.xlane.xlu1 %472 }
 0x237   :  { %v474_v13 = vmul.f32 0.001953125, %v473_v12  ;;  %v1454_v12 = vld [vmem:[%s4242_s8 + $0x20] sm:$0xff] }
 0x239   :  { %v475_v14 = vadd.f32 1e-05, %v474_v13  ;;  %v1455_v13 = vld [vmem:[%s4242_s8 + $0x28] sm:$0xff] }
 0x23a   :  { %v501_v24 = vpop.permute.xlu1 %500 }
 0x23b   :  { %3639 = vrsqrt.f32 %v475_v14  ;;  %v3387_v14 = vpack.c.bf16 %v1455_v13, %v1454_v12  ;;  %v3083_v12 = vld [vmem:[%s4243_s6 + $0x78] sm:$0xff]  ;;  %v3086_v13 = vld [vmem:[%s4243_s6 + $0x80] sm:$0xff] }
 0x245   :  { %v3640_v15 = vpop.eup %3639 }
 0x246   :  { %v481_v16 = vmul.f32 %v3640_v15, %v448_v46  ;;  %v478_v17 = vmul.f32 %v3640_v15, %v445_v43  ;;  %v482_v18 = vmul.f32 %v3640_v15, %v449_v51  ;;  %v477_v19 = vmul.f32 %v3640_v15, %v444_v42 }
 0x247   :  { %v483_v23 = vmul.f32 %v3640_v15, %v450_v50  ;;  %v479_v28 = vmul.f32 %v3640_v15, %v446_v44  ;;  %v480_v36 = vmul.f32 %v3640_v15, %v447_v45  ;;  %v1456_v15 = vld [vmem:[%s4242_s8 + $0x30] sm:$0xff] }
 0x248   :  { %v494_v20 = vmul.f32 %v488_v9, %v481_v16  ;;  %v491_v21 = vmul.f32 %v488_v9, %v478_v17  ;;  %v495_v22 = vmul.f32 %v488_v9, %v482_v18  ;;  %v490_v25 = vmul.f32 %v488_v9, %v477_v19  ;;  %v1457_v16 = vld [vmem:[%s4242_s8 + $0x38] sm:$0xff]  ;;  %v1458_v18 = vld [vmem:[%s4242_s8 + $0x40] sm:$0xff]  ;;  %v1459_v19 = vld [vmem:[%s4242_s8 + $0x48] sm:$0xff] }
 0x249   :  { %v496_v32 = vmul.f32 %v488_v9, %v483_v23  ;;  %v492_v35 = vmul.f32 %v488_v9, %v479_v28  ;;  %v493_v39 = vmul.f32 %v488_v9, %v480_v36  ;;  %v3384_v9 = vpack.c.bf16 %v1453_v11, %v1452_v8  ;;  %v1465_v28 = vld [vmem:[%s4242_s8 + $0x78] sm:$0xff]  ;;  %v3079_v8 = vld [vmem:[%s4243_s6 + $0x68] sm:$0xff]  ;;  %v3082_v11 = vld [vmem:[%s4243_s6 + $0x70] sm:$0xff] }
 0x24a   :  { %v507_v26 = vadd.f32 %v501_v24, %v494_v20  ;;  %v504_v27 = vadd.f32 %v501_v24, %v491_v21  ;;  %v508_v31 = vadd.f32 %v501_v24, %v495_v22  ;;  %v503_v45 = vadd.f32 %v501_v24, %v490_v25  ;;  %v1460_v21 = vld [vmem:[%s4242_s8 + $0x50] sm:$0xff]  ;;  %v1461_v22 = vld [vmem:[%s4242_s8 + $0x58] sm:$0xff]  ;;  %v1463_v25 = vld [vmem:[%s4242_s8 + $0x68] sm:$0xff] }
 0x24b   :  { %v509_v34 = vadd.f32 %v501_v24, %v496_v32  ;;  %v505_v38 = vadd.f32 %v501_v24, %v492_v35  ;;  %v506_v41 = vadd.f32 %v501_v24, %v493_v39  ;;  %3385 = vmatpush1.bf16.msra.mxu1 %v3384_v9  ;;  %v3390_v17 = vpack.c.bf16 %v1457_v16, %v1456_v15  ;;  %v1462_v24 = vld [vmem:[%s4242_s8 + $0x60] sm:$0xff]  ;;  %v1471_v16 = vld [vmem:[%s4242_s8 + $0xa8] sm:$0xff] }
 0x24c   :  { %v514_v29 = vmax.f32 %v507_v26, 0.0  ;;  %v511_v30 = vmax.f32 %v504_v27, 0.0  ;;  %v515_v33 = vmax.f32 %v508_v31, 0.0  ;;  %v510_v53 = vmax.f32 %v503_v45, 0.0  ;;  %3386 = vmatprep.subr.bf16.mxu1 %v3642_v4  ;;  %v1464_v27 = vld [vmem:[%s4242_s8 + $0x70] sm:$0xff]  ;;  %v1467_v31 = vld [vmem:[%s4242_s8 + $0x88] sm:$0xff] }
 0x24d   :  { %v516_v37 = vmax.f32 %v509_v34, 0.0  ;;  %v512_v40 = vmax.f32 %v505_v38, 0.0  ;;  %v513_v42 = vmax.f32 %v506_v41, 0.0  ;;  %v3393_v20 = vpack.c.bf16 %v1459_v19, %v1458_v18  ;;  %v1469_v34 = vld [vmem:[%s4242_s8 + $0x98] sm:$0xff]  ;;  %v3056_v38 = vld [vmem:[%s4243_s6 + $0x10] sm:$0xff]  ;;  %v1470_v15 = vld [vmem:[%s4242_s8 + $0xa0] sm:$0xff] }
 0x24e   :  { %536 = vrot.lane.b32.xlu1 %v514_v29, %s3645_s4  ;;  %520 = vrot.lane.b32.xlu0 %v511_v30, %s3645_s4  ;;  %v3396_v23 = vpack.c.bf16 %v1461_v22, %v1460_v21  ;;  %v3399_v26 = vpack.c.bf16 %v1463_v25, %v1462_v24  ;;  %v1472_v18 = vld [vmem:[%s4242_s8 + $0xb0] sm:$0x3] }
 0x24f   :  { %3388 = vmatpush1.bf16.msra.mxu1 %v3387_v14  ;;  %v3087_v14 = vld [vmem:[%s4243_s6 + $0x88] sm:$0xff] }
 0x250   :  { %3389 = vmatprep.subr.bf16.mxu1 %v3642_v4 }
 0x252   :  { %538 = vrot.lane.b32.xlu1 %v515_v33, %s3645_s4  ;;  %v1468_v33 = vld [vmem:[%s4242_s8 + $0x90] sm:$0xff] }
 0x253   :  { %3391 = vmatpush1.bf16.msra.mxu1 %v3390_v17  ;;  %v3408_v35 = vpack.c.bf16 %v1469_v34, %v1468_v33  ;;  %v3411_v17 = vpack.c.bf16 %v1471_v16, %v1470_v15  ;;  %v3093_v34 = vld [vmem:[%s4244_s9 + $0x10] sm:$0xff]  ;;  %v3112_v15 = vld [vmem:[%s4244_s9 + $0x58] sm:$0x3]  ;;  %v3115_v16 = vld [vmem:[%s4244_s9 + $0x60] sm:$0xff] }
 0x254   :  { %3392 = vmatprep.subr.bf16.mxu1 %v3642_v4 }
 0x256   :  { %540 = vrot.lane.b32.xlu1 %v516_v37, %s3645_s4 }
 0x257   :  { %3394 = vmatpush1.bf16.msra.mxu1 %v3393_v20 }
 0x258   :  { %3395 = vmatprep.subr.bf16.mxu1 %v3642_v4 }
 0x25a   :  { %522 = vrot.lane.b32.xlu1 %v512_v40, %s3645_s4 }
 0x25b   :  { %3397 = vmatpush1.bf16.msra.mxu1 %v3396_v23 }
 0x25c   :  { %3398 = vmatprep.subr.bf16.mxu1 %v3642_v4 }
 0x25e   :  { %524 = vrot.lane.b32.xlu1 %v513_v42, %s3645_s4 }
 0x25f   :  { %3400 = vmatpush1.bf16.msra.mxu1 %v3399_v26 }
 0x260   :  { %3401 = vmatprep.subr.bf16.mxu1 %v3642_v4 }
 0x2c0   :  { %v537_v43 = vpop.permute.xlu1 %536  ;;  %v521_v51 = vpop.permute.xlu0 %520 }
 0x2c4   :  { %v539_v44 = vpop.permute.xlu1 %538 }
 0x2c5   :  { %v542_v46 = vsel %vm526_vm4, %v537_v43, %v539_v44 }
 0x2c6   :  { %v546_v47 = vmax.f32 %v513_v42, %v542_v46  ;;  %v562_v42 = vld [vmem:[%s4243_s6] sm:$0xff]  ;;  %v563_v46 = vld [vmem:[%s4243_s6 + $0x8] sm:$0xff] }
 0x2c8   :  { %v541_v48 = vpop.permute.xlu1 %540  ;;  %550 = vrot.lane.b32.xlu1 %v546_v47, %s3646_s14 }
 0x2c9   :  { %v543_v49 = vsel %vm526_vm4, %v539_v44, %v541_v48  ;;  %v3062_v48 = vld [vmem:[%s4243_s6 + $0x20] sm:$0xff] }
 0x2ca   :  { %v547_v50 = vmax.f32 %v514_v29, %v543_v49  ;;  %v3402_v29 = vpack.c.bf16 %v1465_v28, %v1464_v27 }
 0x2cc   :  { %552 = vrot.lane.b32.xlu1 %v547_v50, %s3646_s14  ;;  %v523_v52 = vpop.permute.xlu1 %522  ;;  %3403 = vmatpush1.bf16.msra.mxu1 %v3402_v29  ;;  %v3063_v50 = vld [vmem:[%s4243_s6 + $0x28] sm:$0xff] }
 0x2cd   :  { %v527_v54 = vsel %vm526_vm4, %v521_v51, %v523_v52  ;;  %3404 = vmatprep.subr.bf16.mxu1 %v3642_v4 }
 0x2ce   :  { %v531_v55 = vmax.f32 %v510_v53, %v527_v54 }
 0x2d0   :  { %v525_v56 = vpop.permute.xlu1 %524 }
 0x2d1   :  { %v528_v57 = vsel %vm526_vm4, %v523_v52, %v525_v56  ;;  %v3066_v52 = vld [vmem:[%s4243_s6 + $0x30] sm:$0xff] }
 0x2d2   :  { %v532_v59 = vmax.f32 %v511_v30, %v528_v57  ;;  %v1466_v30 = vld [vmem:[%s4242_s8 + $0x80] sm:$0xff] }
 0x2d3   :  { %v3405_v32 = vpack.c.bf16 %v1467_v31, %v1466_v30  ;;  %v3070_v57 = vld [vmem:[%s4243_s6 + $0x40] sm:$0xff] }
 0x2d5   :  { %3406 = vmatpush1.bf16.msra.mxu1 %v3405_v32 }
 0x2d6   :  { %3407 = vmatprep.subr.bf16.mxu1 %v3642_v4 }
 0x2d9   :  { %3409 = vmatpush1.bf16.msra.mxu1 %v3408_v35 }
 0x2da   :  { %3410 = vmatprep.subr.bf16.mxu1 %v3642_v4  ;;  %v3057_v4 = vld [vmem:[%s4243_s6 + $0x18] sm:$0xff] }
 0x2dd   :  { %3412 = vmatpush1.bf16.msra.mxu1 %v3411_v17 }
 0x2de   :  { %1528 = vmatprep.subr.mxu1 %v3641_v3 }
 0x2e1   :  { %3090 = vmatpush1.msk.msra.mxu1 %vm1480_vm15, %v1472_v18 }
 0x33a   :  { %v551_v58 = vpop.permute.xlu1 %550 }
 0x33e   :  { %v553_v60 = vpop.permute.xlu1 %552 }
 0x33f   :  { %v555_v61 = vsel %vm554_vm5, %v551_v58, %v553_v60  ;;  %v559_v62 = vmax.f32 %v532_v59, %v553_v60  ;;  %v3071_v60 = vld [vmem:[%s4243_s6 + $0x48] sm:$0xff] }
 0x340   :  { %v558_v63 = vmax.f32 %v531_v55, %v555_v61  ;;  %v3067_v55 = vld [vmem:[%s4243_s6 + $0x38] sm:$0xff] }
 0x341   :  { %v3881_v0 = vmul.f32 %v559_v62, %v3863_v7  ;;  %v1430_v7 = vld [vmem:[%s4241_s7] sm:$0xff]  ;;  %v3074_v62 = vld [vmem:[%s4243_s6 + $0x50] sm:$0xff] }
 0x342   :  { %v3884_v1 = vmul.f32 %v558_v63, %v3861_v6  ;;  %v1431_v6 = vld [vmem:[%s4241_s7 + $0x8] sm:$0xff]  ;;  %s3662_s7 = smov 102  }
 0x343   :  { %571 = vrot.lane.b32.xlu0 %v3881_v0, %s3647_s15 }
 0x344   :  { %569 = vrot.lane.b32.xlu1 %v3884_v1, %s3647_s15 }
 0x347   :  { %749 = vrot.lane.b32.xlu0 %v3881_v0, %s3648_s16 }
 0x348   :  { %747 = vrot.lane.b32.xlu1 %v3884_v1, %s3648_s16 }
 0x34b   :  { %847 = vrot.lane.b32.xlu0 %v3881_v0, %s3649_s17 }
 0x34c   :  { %845 = vrot.lane.b32.xlu1 %v3884_v1, %s3649_s17 }
 0x34f   :  { %945 = vrot.lane.b32.xlu0 %v3881_v0, %s3650_s18 }
 0x350   :  { %943 = vrot.lane.b32.xlu1 %v3884_v1, %s3650_s18 }
 0x353   :  { %1043 = vrot.lane.b32.xlu0 %v3881_v0, %s3651_s1 }
 0x354   :  { %1041 = vrot.lane.b32.xlu1 %v3884_v1, %s3651_s1 }
 0x357   :  { %1141 = vrot.lane.b32.xlu0 %v3881_v0, %s3652_s19 }
 0x358   :  { %1139 = vrot.lane.b32.xlu1 %v3884_v1, %s3652_s19 }
 0x35b   :  { %1239 = vrot.lane.b32.xlu0 %v3881_v0, %s3653_s20 }
 0x35c   :  { %1237 = vrot.lane.b32.xlu1 %v3884_v1, %s3653_s20 }
 0x35f   :  { %1337 = vrot.lane.b32.xlu0 %v3881_v0, %s3654_s21 }
 0x360   :  { %1335 = vrot.lane.b32.xlu1 %v3884_v1, %s3654_s21 }
 0x363   :  { %1439 = vperm.xlu0 %3562, %v1431_v6  }
 0x364   :  { %1434 = vperm.xlu1 %3563, %v1430_v7   ;;  %v3078_v7 = vld [vmem:[%s4243_s6 + $0x60] sm:$0xff] }
 0x3b5   :  { %v572_v36 = vpop.permute.xlu0 %571 }
 0x3b6   :  { %584 = vmatprep.subr.mxu0 %v572_v36  ;;  %v570_v37 = vpop.permute.xlu1 %569 }
 0x3b7   :  { %v574_v39 = vsel %vm573_vm6, %v570_v37, %v572_v36 }
 0x3b8   :  { %585 = vmatpush1.msra.mxu0 %v574_v39  ;;  %v3023_v39 = vld [vmem:[%s4245_s10] sm:$0xff] }
 0x3b9   :  { %v750_v40 = vpop.permute.xlu0 %749  ;;  %3058 = vmatmul.mubr.msk.f32.vlgmr.msra.gmra.mrb[8].mxu0 %vm577_vm7, %v3056_v38  ;;  %667 = vmatprep.subr.mxu0 %v3881_v0 }
 0x3ba   :  { %668 = vmatpush1.msra.mxu0 %v3884_v1  ;;  %654 = vmatprep.mubr.f32.mxu0 %v3641_v3  ;;  %v748_v41 = vpop.permute.xlu1 %747  ;;  %v3075_v1 = vld [vmem:[%s4243_s6 + $0x58] sm:$0xff] }
 0x3bb   :  { %761 = vmatprep.subr.mxu0 %v750_v40  ;;  %v752_v43 = vsel %vm751_vm8, %v748_v41, %v750_v40  ;;  %v3024_v40 = vld [vmem:[%s4245_s10 + $0x8] sm:$0x3] }
 0x3bd   :  { %3059 = vmatmul.mubr.msk.f32.gmra.mrb[10].mxu0 %vm577_vm7, %v3057_v4  ;;  %v848_v44 = vpop.permute.xlu0 %847 }
 0x3be   :  { %731 = vmatprep.mubr.f32.mxu0 %v3641_v3  ;;  %v846_v47 = vpop.permute.xlu1 %845 }
 0x3bf   :  { %v850_v45 = vsel %vm849_vm9, %v846_v47, %v848_v44 }
 0x3c1   :  { %3060 = vmatmul.mubr.msk.f32.vlgmr.msra.gmra.mrb[8].mxu0 %vm577_vm7, %v562_v42  ;;  %v946_v49 = vpop.permute.xlu0 %945 }
 0x3c2   :  { %762 = vmatpush1.msra.mxu0 %v752_v43  ;;  %737 = vmatprep.mubr.f32.mxu0 %v3641_v3  ;;  %v944_v51 = vpop.permute.xlu1 %943 }
 0x3c3   :  { %859 = vmatprep.subr.mxu0 %v848_v44  ;;  %v948_v53 = vsel %vm947_vm10, %v944_v51, %v946_v49 }
 0x3c5   :  { %3061 = vmatmul.mubr.msk.f32.gmra.mrb[10].mxu0 %vm577_vm7, %v563_v46  ;;  %v1044_v54 = vpop.permute.xlu0 %1043 }
 0x3c6   :  { %825 = vmatprep.mubr.f32.mxu0 %v3641_v3  ;;  %v1042_v56 = vpop.permute.xlu1 %1041 }
 0x3c7   :  { %v1046_v58 = vsel %vm1045_vm11, %v1042_v56, %v1044_v54 }
 0x3c9   :  { %3064 = vmatmul.mubr.msk.f32.vlgmr.msra.gmra.mrb[8].mxu0 %vm577_vm7, %v3062_v48  ;;  %v1142_v59 = vpop.permute.xlu0 %1141  ;;  %v3094_v48 = vld [vmem:[%s4244_s9 + $0x18] sm:$0x3] }
 0x3ca   :  { %860 = vmatpush1.msra.mxu0 %v850_v45  ;;  %831 = vmatprep.mubr.f32.mxu0 %v3641_v3  ;;  %v1140_v61 = vpop.permute.xlu1 %1139  ;;  %v1559_v45 = vld [vmem:[%s4244_s9] sm:$0xff] }
 0x3cb   :  { %957 = vmatprep.subr.mxu0 %v946_v49  ;;  %v1144_v63 = vsel %vm1143_vm12, %v1140_v61, %v1142_v59 }
 0x3cd   :  { %3065 = vmatmul.mubr.msk.f32.gmra.mrb[10].mxu0 %vm577_vm7, %v3063_v50  ;;  %v1240_v0 = vpop.permute.xlu0 %1239 }
 0x3ce   :  { %923 = vmatprep.mubr.f32.mxu0 %v3641_v3  ;;  %v1238_v6 = vpop.permute.xlu1 %1237 }
 0x3cf   :  { %v1242_v2 = vsel %vm1241_vm13, %v1238_v6, %v1240_v0  ;;  %v3107_v6 = vld [vmem:[%s4244_s9 + $0x40] sm:$0xff] }
 0x3d1   :  { %3068 = vmatmul.mubr.msk.f32.vlgmr.msra.gmra.mrb[8].mxu0 %vm577_vm7, %v3066_v52  ;;  %v1338_v5 = vpop.permute.xlu0 %1337 }
 0x3d2   :  { %958 = vmatpush1.msra.mxu0 %v948_v53  ;;  %929 = vmatprep.mubr.f32.mxu0 %v3641_v3  ;;  %v1336_v10 = vpop.permute.xlu1 %1335  ;;  %v1560_v53 = vld [vmem:[%s4244_s9 + $0x8] sm:$0x3] }
 0x3d3   :  { %1055 = vmatprep.subr.mxu0 %v1044_v54  ;;  %v1340_v9 = vsel %vm1339_vm14, %v1336_v10, %v1338_v5  ;;  %v3099_v54 = vld [vmem:[%s4244_s9 + $0x20] sm:$0xff]  ;;  %v3108_v10 = vld [vmem:[%s4244_s9 + $0x48] sm:$0x3] }
 0x3d5   :  { %3069 = vmatmul.mubr.msk.f32.gmra.mrb[10].mxu0 %vm577_vm7, %v3067_v55 }
 0x3d6   :  { %1021 = vmatprep.mubr.f32.mxu0 %v3641_v3 }
 0x3d9   :  { %3072 = vmatmul.mubr.msk.f32.vlgmr.msra.gmra.mrb[8].mxu0 %vm577_vm7, %v3070_v57 }
 0x3da   :  { %1056 = vmatpush1.msra.mxu0 %v1046_v58  ;;  %1027 = vmatprep.mubr.f32.mxu0 %v3641_v3 }
 0x3db   :  { %1153 = vmatprep.subr.mxu0 %v1142_v59  ;;  %v3100_v59 = vld [vmem:[%s4244_s9 + $0x28] sm:$0x3] }
 0x3dd   :  { %3073 = vmatmul.mubr.msk.f32.gmra.mrb[10].mxu0 %vm577_vm7, %v3071_v60  ;;  %v3103_v60 = vld [vmem:[%s4244_s9 + $0x30] sm:$0xff] }
 0x3de   :  { %1119 = vmatprep.mubr.f32.mxu0 %v3641_v3 }
 0x3e1   :  { %3076 = vmatmul.mubr.msk.f32.vlgmr.msra.gmra.mrb[8].mxu0 %vm577_vm7, %v3074_v62 }
 0x3e2   :  { %1154 = vmatpush1.msra.mxu0 %v1144_v63  ;;  %1125 = vmatprep.mubr.f32.mxu0 %v3641_v3  ;;  %v1440_v24 = vpop.permute.xlu0 %1439 }
 0x3e3   :  { %1251 = vmatprep.subr.mxu0 %v1240_v0  ;;  %v1435_v19 = vpop.permute.xlu1 %1434 }
 0x3e5   :  { %3077 = vmatmul.mubr.msk.f32.gmra.mrb[10].mxu0 %vm577_vm7, %v3075_v1  ;;  %v3104_v1 = vld [vmem:[%s4244_s9 + $0x38] sm:$0x3] }
 0x3e6   :  { %1217 = vmatprep.mubr.f32.mxu0 %v3641_v3 }
 0x3e9   :  { %3080 = vmatmul.mubr.msk.f32.vlgmr.msra.gmra.mrb[8].mxu0 %vm577_vm7, %v3078_v7 }
 0x3ea   :  { %1252 = vmatpush1.msra.mxu0 %v1242_v2  ;;  %1223 = vmatprep.mubr.f32.mxu0 %v3641_v3 }
 0x3eb   :  { %1349 = vmatprep.subr.mxu0 %v1338_v5 }
 0x3ed   :  { %3081 = vmatmul.mubr.msk.f32.gmra.mrb[10].mxu0 %vm577_vm7, %v3079_v8 }
 0x3ee   :  { %1315 = vmatprep.mubr.f32.mxu0 %v3641_v3 }
 0x3f1   :  { %3084 = vmatmul.mubr.msk.f32.vlgmr.msra.gmra.mrb[8].mxu0 %vm577_vm7, %v3082_v11  ;;  %v3111_v11 = vld [vmem:[%s4244_s9 + $0x50] sm:$0xff] }
 0x3f2   :  { %1350 = vmatpush1.msra.mxu0 %v1340_v9  ;;  %1321 = vmatprep.mubr.f32.mxu0 %v3641_v3 }
 0x3f5   :  { %3085 = vmatmul.mubr.msk.f32.gmra.mrb[10].mxu0 %vm577_vm7, %v3083_v12 }
 0x3f6   :  { %1413 = vmatprep.mubr.f32.mxu0 %v3641_v3 }
 0x3f9   :  { %3088 = vmatmul.mubr.msk.f32.vlgmr.msra.gmra.mrb[8].mxu0 %vm577_vm7, %v3086_v13 }
 0x3fa   :  { %1419 = vmatprep.mubr.f32.mxu0 %v3641_v3 }
 0x3fd   :  { %3089 = vmatmul.mubr.msk.f32.gmra.mrb[10].mxu0 %vm577_vm7, %v3087_v14 }
 0x4cc   :  { %v1415_v20 = vpop.f32.mrb[8].mxu0 }
 0x4cd   :  { %v1442_v21 = vadd.f32 %v1435_v19, %v1415_v20  ;;  %v1417_v22 = vpop.f32.mrb[9].mxu0 }
 0x4ce   :  { %v1443_v23 = vadd.f32 %v1435_v19, %v1417_v22  ;;  %v3119_v22 = vld [vmem:[%s4244_s9 + $0x70] sm:$0xff] }
 0x4cf   :  { %v1446_v27 = vmax.f32 %v1442_v21, 0.0  ;;  %v3116_v21 = vld [vmem:[%s4244_s9 + $0x68] sm:$0x3] }
 0x4d0   :  { %v1447_v25 = vmax.f32 %v1443_v23, 0.0  ;;  %v1421_v26 = vpop.f32.mrb[10].mxu0 }
 0x4d1   :  { %v1444_v28 = vadd.f32 %v1440_v24, %v1421_v26  ;;  %v1423_v29 = vpop.f32.mrb[11].mxu0 }
 0x4d2   :  { %v1445_v30 = vadd.f32 %v1440_v24, %v1423_v29  ;;  %3091 = vmatprep.mubr.msk.f32.mxu1 %vm1473_vm0, %v1447_v25 }
 0x4d3   :  { %1549 = vmatmul.mubr.f32.vlgmr.msra.gmra.mrb[0].mxu1 %v1446_v27  ;;  %v1448_v31 = vmax.f32 %v1444_v28, 0.0  ;;  %v3120_v27 = vld [vmem:[%s4244_s9 + $0x78] sm:$0x3]  ;;  %v3123_v28 = vld [vmem:[%s4244_s9 + $0x80] sm:$0xff] }
 0x4d4   :  { %v1449_v3 = vmax.f32 %v1445_v30, 0.0 }
 0x4d6   :  { %3092 = vmatprep.mubr.msk.f32.mxu1 %vm1473_vm0, %v1449_v3 }
 0x4d7   :  { %1554 = vmatmul.mubr.f32.gmra.mrb[2].mxu1 %v1448_v31 }
 0x4d8   :  { %3242 = vmatprep.mubr.msk.f32.mxu1 %vm1572_vm1, %v3093_v34 }
 0x5a6   :  { %v1550_v32 = vpop.f32.mrb[0].mxu1 }
 0x5a7   :  { %v1552_v33 = vpop.f32.mrb[1].mxu1 }
 0x5a8   :  { %v3127_v33 = vld [vmem:[%s4244_s9 + $0x90] sm:$0xff] }
 0x5aa   :  { %v1555_v35 = vpop.f32.mrb[2].mxu1 }
 0x5ab   :  { %v1557_v36 = vpop.f32.mrb[3].mxu1  ;;  %v3569_v37 = vpack.i.bf16 %v1555_v35, %v1550_v32  ;;  %v3417_v38 = vpack.c.bf16 %v1555_v35, %v1550_v32  ;;  %v3124_v32 = vld [vmem:[%s4244_s9 + $0x88] sm:$0x3] }
 0x5ad   :  { %3570 = vrot.lane.b32.xlu0 %v3569_v37, %s3655_s27  ;;  %3565 = vrot.lane.b32.xlu1 %v3569_v37, %s3648_s16  ;;  %s3661_s16 = smov 100  }
 0x5b1   :  { %3580 = vrot.lane.b32.xlu0 %v3569_v37, %s3656_s28  ;;  %3575 = vrot.lane.b32.xlu1 %v3569_v37, %s3657_s29 }
 0x5b5   :  { %3590 = vrot.lane.b32.xlu0 %v3569_v37, %s3651_s1  ;;  %3585 = vrot.lane.b32.xlu1 %v3569_v37, %s3649_s17 }
 0x5b9   :  { %3600 = vrot.lane.b32.xlu0 %v3569_v37, %s3646_s14  ;;  %3595 = vrot.lane.b32.xlu1 %v3569_v37, %s3658_s30  ;;  %s3663_s14 = smov 98  }
 0x5bd   :  { %3610 = vrot.lane.b32.xlu0 %v3569_v37, %s3652_s19  ;;  %3605 = vrot.lane.b32.xlu1 %v3569_v37, %s3659_s12 }
 0x5c1   :  { %3620 = vrot.lane.b32.xlu0 %v3569_v37, %s3660_s0  ;;  %3615 = vrot.lane.b32.xlu1 %v3569_v37, %s3654_s21 }
 0x5c5   :  { %3630 = vrot.lane.b32.xlu0 %v3569_v37, %s3661_s16  ;;  %3625 = vrot.lane.b32.xlu1 %v3569_v37, %s3662_s7 }
 0x5c9   :  { %3027 = vperm.xlu0 %3562, %v3023_v39   ;;  %3635 = vrot.lane.b32.xlu1 %v3569_v37, %s3663_s14  ;;  %v3131_v39 = vld [vmem:[%s4244_s9 + $0xa0] sm:$0xff] }
 0x5cd   :  { %3032 = vperm.xlu1 %3563, %v3024_v40  }
 0x61f   :  { %v3566_v4 = vpop.permute.xlu1 %3565  ;;  %v3571_v43 = vpop.permute.xlu0 %3570 }
 0x620   :  { %v3568_v41 = vunpack.i.h.bf16 %v3566_v4  ;;  %v3567_v42 = vunpack.i.l.bf16 %v3566_v4  ;;  %v3573_v46 = vunpack.i.h.bf16 %v3571_v43  ;;  %v3572_v47 = vunpack.i.l.bf16 %v3571_v43  ;;  %v3132_v43 = vld [vmem:[%s4244_s9 + $0xa8] sm:$0x3] }
 0x622   :  { %v3413_v44 = vpack.c.bf16 %v3568_v41, %v3567_v42  ;;  %v3421_v49 = vpack.c.bf16 %v3573_v46, %v3572_v47 }
 0x623   :  { %v3576_v50 = vpop.permute.xlu1 %3575  ;;  %v3581_v56 = vpop.permute.xlu0 %3580 }
 0x624   :  { %3414 = vmatprep.subr.bf16.mxu1 %v3413_v44  ;;  %v3578_v51 = vunpack.i.h.bf16 %v3576_v50  ;;  %v3577_v52 = vunpack.i.l.bf16 %v3576_v50  ;;  %v3583_v57 = vunpack.i.h.bf16 %v3581_v56  ;;  %v3582_v58 = vunpack.i.l.bf16 %v3581_v56  ;;  %v3139_v50 = vld [vmem:[%s4244_s9 + $0xc0] sm:$0xff]  ;;  %v3143_v56 = vld [vmem:[%s4244_s9 + $0xd0] sm:$0xff] }
 0x625   :  { %3416 = vmatpush3.bf16.msra.mxu1 %v3413_v44  ;;  %v3135_v44 = vld [vmem:[%s4244_s9 + $0xb0] sm:$0xff] }
 0x626   :  { %3418 = vmatprep.subr.bf16.mxu1 %v3417_v38  ;;  %v3425_v55 = vpack.c.bf16 %v3578_v51, %v3577_v52  ;;  %v3429_v61 = vpack.c.bf16 %v3583_v57, %v3582_v58 }
 0x627   :  { %v3586_v62 = vpop.permute.xlu1 %3585  ;;  %v3591_v2 = vpop.permute.xlu0 %3590 }
 0x628   :  { %3243 = vmatmul.mubr.msk.f32.vlgmr.msra.gmra.mrb[4].mxu1 %vm1572_vm1, %v3094_v48  ;;  %v3588_v63 = vunpack.i.h.bf16 %v3586_v62  ;;  %v3587_v0 = vunpack.i.l.bf16 %v3586_v62  ;;  %v3593_v5 = vunpack.i.h.bf16 %v3591_v2  ;;  %v3592_v8 = vunpack.i.l.bf16 %v3591_v2  ;;  %v3147_v62 = vld [vmem:[%s4244_s9 + $0xe0] sm:$0xff] }
 0x629   :  { %3420 = vmatpush3.bf16.msra.mxu1 %v3417_v38  ;;  %3249 = vmatprep.mubr.msk.f32.mxu1 %vm1572_vm1, %v1559_v45  ;;  %v3128_v38 = vld [vmem:[%s4244_s9 + $0x98] sm:$0x3] }
 0x62a   :  { %3422 = vmatprep.subr.bf16.mxu1 %v3421_v49  ;;  %v3433_v7 = vpack.c.bf16 %v3588_v63, %v3587_v0  ;;  %v3437_v9 = vpack.c.bf16 %v3593_v5, %v3592_v8  ;;  %v3148_v0 = vld [vmem:[%s4244_s9 + $0xe8] sm:$0x3] }
 0x62b   :  { %v3596_v12 = vpop.permute.xlu1 %3595  ;;  %v3601_v18 = vpop.permute.xlu0 %3600 }
 0x62c   :  { %v3598_v13 = vunpack.i.h.bf16 %v3596_v12  ;;  %v3597_v14 = vunpack.i.l.bf16 %v3596_v12  ;;  %v3603_v19 = vunpack.i.h.bf16 %v3601_v18  ;;  %v3602_v20 = vunpack.i.l.bf16 %v3601_v18 }
 0x62e   :  { %v3441_v17 = vpack.c.bf16 %v3598_v13, %v3597_v14  ;;  %v3445_v23 = vpack.c.bf16 %v3603_v19, %v3602_v20 }
 0x62f   :  { %v3606_v24 = vpop.permute.xlu1 %3605  ;;  %v3611_v30 = vpop.permute.xlu0 %3610 }
 0x630   :  { %3250 = vmatmul.mubr.msk.f32.vlgmr.msra.gmra.mrb[4].mxu1 %vm1572_vm1, %v1560_v53  ;;  %v3608_v25 = vunpack.i.h.bf16 %v3606_v24  ;;  %v3607_v26 = vunpack.i.l.bf16 %v3606_v24  ;;  %v3613_v3 = vunpack.i.h.bf16 %v3611_v30  ;;  %v3612_v31 = vunpack.i.l.bf16 %v3611_v30 }
 0x631   :  { %3424 = vmatpush3.bf16.msra.mxu1 %v3421_v49  ;;  %3256 = vmatprep.mubr.msk.f32.mxu1 %vm1572_vm1, %v3099_v54  ;;  %v3136_v49 = vld [vmem:[%s4244_s9 + $0xb8] sm:$0x3] }
 0x632   :  { %3426 = vmatprep.subr.bf16.mxu1 %v3425_v55  ;;  %v3449_v29 = vpack.c.bf16 %v3608_v25, %v3607_v26  ;;  %v3453_v34 = vpack.c.bf16 %v3613_v3, %v3612_v31 }
 0x633   :  { %v3616_v35 = vpop.permute.xlu1 %3615  ;;  %v3621_v4 = vpop.permute.xlu0 %3620 }
 0x634   :  { %v3618_v36 = vunpack.i.h.bf16 %v3616_v35  ;;  %v3617_v37 = vunpack.i.l.bf16 %v3616_v35  ;;  %v3623_v41 = vunpack.i.h.bf16 %v3621_v4  ;;  %v3622_v42 = vunpack.i.l.bf16 %v3621_v4 }
 0x636   :  { %v3457_v40 = vpack.c.bf16 %v3618_v36, %v3617_v37  ;;  %v3461_v46 = vpack.c.bf16 %v3623_v41, %v3622_v42 }
 0x637   :  { %v3626_v47 = vpop.permute.xlu1 %3625  ;;  %v3631_v52 = vpop.permute.xlu0 %3630 }
 0x638   :  { %3257 = vmatmul.mubr.msk.f32.vlgmr.msra.gmra.mrb[4].mxu1 %vm1572_vm1, %v3100_v59  ;;  %v3628_v48 = vunpack.i.h.bf16 %v3626_v47  ;;  %v3627_v45 = vunpack.i.l.bf16 %v3626_v47  ;;  %v3633_v53 = vunpack.i.h.bf16 %v3631_v52  ;;  %v3632_v54 = vunpack.i.l.bf16 %v3631_v52 }
 0x639   :  { %3428 = vmatpush3.bf16.msra.mxu1 %v3425_v55  ;;  %3263 = vmatprep.mubr.msk.f32.mxu1 %vm1572_vm1, %v3103_v60  ;;  %v3140_v55 = vld [vmem:[%s4244_s9 + $0xc8] sm:$0x3] }
 0x63a   :  { %3430 = vmatprep.subr.bf16.mxu1 %v3429_v61  ;;  %v3465_v51 = vpack.c.bf16 %v3628_v48, %v3627_v45  ;;  %v3469_v57 = vpack.c.bf16 %v3633_v53, %v3632_v54 }
 0x63b   :  { %v3636_v58 = vpop.permute.xlu1 %3635 }
 0x63c   :  { %v3638_v59 = vunpack.i.h.bf16 %v3636_v58  ;;  %v3637_v60 = vunpack.i.l.bf16 %v3636_v58 }
 0x63e   :  { %v3473_v63 = vpack.c.bf16 %v3638_v59, %v3637_v60 }
 0x640   :  { %3264 = vmatmul.mubr.msk.f32.vlgmr.msra.gmra.mrb[4].mxu1 %vm1572_vm1, %v3104_v1  ;;  %v3151_v1 = vld [vmem:[%s4244_s9 + $0xf0] sm:$0xff] }
 0x641   :  { %3432 = vmatpush3.bf16.msra.mxu1 %v3429_v61  ;;  %3270 = vmatprep.mubr.msk.f32.mxu1 %vm1572_vm1, %v3107_v6  ;;  %v3144_v61 = vld [vmem:[%s4244_s9 + $0xd8] sm:$0x3] }
 0x642   :  { %3434 = vmatprep.subr.bf16.mxu1 %v3433_v7  ;;  %v3152_v6 = vld [vmem:[%s4244_s9 + $0xf8] sm:$0x3] }
 0x648   :  { %3271 = vmatmul.mubr.msk.f32.vlgmr.msra.gmra.mrb[4].mxu1 %vm1572_vm1, %v3108_v10  ;;  %v3028_v5 = vpop.permute.xlu0 %3027 }
 0x649   :  { %3436 = vmatpush3.bf16.msra.mxu1 %v3433_v7  ;;  %3277 = vmatprep.mubr.msk.f32.mxu1 %vm1572_vm1, %v3111_v11 }
 0x64a   :  { %3438 = vmatprep.subr.bf16.mxu1 %v3437_v9 }
 0x64c   :  { %v3033_v7 = vpop.permute.xlu1 %3032 }
 0x650   :  { %3278 = vmatmul.mubr.msk.f32.vlgmr.msra.gmra.mrb[4].mxu1 %vm1572_vm1, %v3112_v15 }
 0x651   :  { %3440 = vmatpush3.bf16.msra.mxu1 %v3437_v9  ;;  %3284 = vmatprep.mubr.msk.f32.mxu1 %vm1572_vm1, %v3115_v16 }
 0x652   :  { %3442 = vmatprep.subr.bf16.mxu1 %v3441_v17 }
 0x658   :  { %3285 = vmatmul.mubr.msk.f32.vlgmr.msra.gmra.mrb[4].mxu1 %vm1572_vm1, %v3116_v21 }
 0x659   :  { %3444 = vmatpush3.bf16.msra.mxu1 %v3441_v17  ;;  %3291 = vmatprep.mubr.msk.f32.mxu1 %vm1572_vm1, %v3119_v22 }
 0x65a   :  { %3446 = vmatprep.subr.bf16.mxu1 %v3445_v23 }
 0x660   :  { %3292 = vmatmul.mubr.msk.f32.vlgmr.msra.gmra.mrb[4].mxu1 %vm1572_vm1, %v3120_v27 }
 0x661   :  { %3448 = vmatpush3.bf16.msra.mxu1 %v3445_v23  ;;  %3298 = vmatprep.mubr.msk.f32.mxu1 %vm1572_vm1, %v3123_v28 }
 0x662   :  { %3450 = vmatprep.subr.bf16.mxu1 %v3449_v29 }
 0x668   :  { %3299 = vmatmul.mubr.msk.f32.vlgmr.msra.gmra.mrb[4].mxu1 %vm1572_vm1, %v3124_v32 }
 0x669   :  { %3452 = vmatpush3.bf16.msra.mxu1 %v3449_v29  ;;  %3305 = vmatprep.mubr.msk.f32.mxu1 %vm1572_vm1, %v3127_v33 }
 0x66a   :  { %3454 = vmatprep.subr.bf16.mxu1 %v3453_v34 }
 0x670   :  { %3306 = vmatmul.mubr.msk.f32.vlgmr.msra.gmra.mrb[4].mxu1 %vm1572_vm1, %v3128_v38 }
 0x671   :  { %3456 = vmatpush3.bf16.msra.mxu1 %v3453_v34  ;;  %3312 = vmatprep.mubr.msk.f32.mxu1 %vm1572_vm1, %v3131_v39 }
 0x672   :  { %3458 = vmatprep.subr.bf16.mxu1 %v3457_v40 }
 0x678   :  { %3313 = vmatmul.mubr.msk.f32.vlgmr.msra.gmra.mrb[4].mxu1 %vm1572_vm1, %v3132_v43 }
 0x679   :  { %3460 = vmatpush3.bf16.msra.mxu1 %v3457_v40  ;;  %3319 = vmatprep.mubr.msk.f32.mxu1 %vm1572_vm1, %v3135_v44 }
 0x67a   :  { %3462 = vmatprep.subr.bf16.mxu1 %v3461_v46 }
 0x680   :  { %3320 = vmatmul.mubr.msk.f32.vlgmr.msra.gmra.mrb[4].mxu1 %vm1572_vm1, %v3136_v49 }
 0x681   :  { %3464 = vmatpush3.bf16.msra.mxu1 %v3461_v46  ;;  %3326 = vmatprep.mubr.msk.f32.mxu1 %vm1572_vm1, %v3139_v50 }
 0x682   :  { %3466 = vmatprep.subr.bf16.mxu1 %v3465_v51 }
 0x688   :  { %3327 = vmatmul.mubr.msk.f32.vlgmr.msra.gmra.mrb[4].mxu1 %vm1572_vm1, %v3140_v55 }
 0x689   :  { %3468 = vmatpush3.bf16.msra.mxu1 %v3465_v51  ;;  %3333 = vmatprep.mubr.msk.f32.mxu1 %vm1572_vm1, %v3143_v56 }
 0x68a   :  { %3470 = vmatprep.subr.bf16.mxu1 %v3469_v57 }
 0x690   :  { %3334 = vmatmul.mubr.msk.f32.vlgmr.msra.gmra.mrb[4].mxu1 %vm1572_vm1, %v3144_v61 }
 0x691   :  { %3472 = vmatpush3.bf16.msra.mxu1 %v3469_v57  ;;  %3340 = vmatprep.mubr.msk.f32.mxu1 %vm1572_vm1, %v3147_v62 }
 0x692   :  { %3474 = vmatprep.subr.bf16.mxu1 %v3473_v63 }
 0x698   :  { %3341 = vmatmul.mubr.msk.f32.vlgmr.msra.gmra.mrb[4].mxu1 %vm1572_vm1, %v3148_v0 }
 0x699   :  { %3476 = vmatpush3.bf16.msra.mxu1 %v3473_v63  ;;  %3347 = vmatprep.mubr.msk.f32.mxu1 %vm1572_vm1, %v3151_v1 }
 0x6a0   :  { %3348 = vmatmul.mubr.msk.f32.vlgmr.msra.gmra.mrb[4].mxu1 %vm1572_vm1, %v3152_v6 }
 0x773   :  { %v3349_v2 = vpop.f32.mrb[4].mxu1 }
 0x774   :  { %v3036_v8 = vadd.f32 %v3349_v2, %v3033_v7  ;;  %v3012_v10 = vpop.f32.mrb[5].mxu1 }
 0x775   :  { %v3035_v11 = vadd.f32 %v3028_v5, %v3012_v10 }
 0x776   :  { %3040 = vst.msk [vmem:[%s4246_s11 + $0x8] sm:$0x3] %vm3039_vm2, %v3036_v8 }
 0x777   :  { %3038 = vst.msk [vmem:[%s4246_s11] sm:$0xff] %vm3037_vm3, %v3035_v11 }

</bundles_post_ra>
